<compile_context>
chip_gen: v5e
topology: v5e:2x2
jax: 0.10.0
libtpu: 0.0.40
codegen_flags: <defaults>
</compile_context>

<pallas_src>
import functools

import jax
import jax.numpy as jnp
from jax import lax
from jax.experimental import pallas as pl
from jax.experimental.pallas import tpu as pltpu

EPS = 1e-5  # nn.BatchNorm2d default


# ----------------------------------------------------------------------------
# Fused BasicBlock kernel, compact channel-major layout.
#
#   x_ref  : (C, N)    input,  row = channel, lane q = b*H*W + y*W + x
#   w*_ref : (C, 9*C)  conv weights, column = (ky*3 + kx)*C + cin
#   g*/b*  : (C, 1)    BatchNorm affine parameters
#   o_ref  : (C, N)    output, same compact layout (all lanes valid)
# ----------------------------------------------------------------------------
def _basic_block_kernel(x_ref, w1_ref, w2_ref, g1_ref, b1_ref, g2_ref, b2_ref,
                        o_ref, *, H, W, C, N, eps):
    inv_n = 1.0 / float(N)
    log2w = W.bit_length() - 1
    f32 = jnp.float32

    # Per-pixel (row, col) coordinates inside their image, from the flat lane
    # id (H, W are powers of two -> pure shift/and, guaranteed to lower).
    q = lax.broadcasted_iota(jnp.int32, (1, N), 1)
    cx = q & (W - 1)                       # column within row
    ry = (q & (H * W - 1)) >> log2w        # row within image

    col_ok = {-1: (cx >= 1).astype(f32), 0: None, 1: (cx <= W - 2).astype(f32)}
    row_ok = {-1: (ry >= 1).astype(f32), 0: None, 1: (ry <= H - 2).astype(f32)}

    # Combined boundary mask per tap (None == all lanes valid, skip multiply).
    tap_mask = {}
    for dy in (-1, 0, 1):
        for dx in (-1, 0, 1):
            r, c = row_ok[dy], col_ok[dx]
            if r is None and c is None:
                m = None
            elif r is None:
                m = c
            elif c is None:
                m = r
            else:
                m = r * c
            tap_mask[(dy, dx)] = m

    PAD = W + 1                            # covers the largest shift |dy*W+dx|
    zpad = jnp.zeros((C, PAD), f32)

    def conv3x3_taps(x, w_ref):
        # 9 accumulated MXU dots; RHS = lane-shifted view of x, masked at the
        # row / image boundaries.  No im2col matrix is materialised.
        # (A pltpu.roll per tap is the equivalent alternative; static slices of
        #  the zero-extended value have identical data movement and unambiguous
        #  semantics.)
        xe = jnp.concatenate([zpad, x, zpad], axis=1)       # (C, N + 2*PAD)
        acc = None
        for dy in (-1, 0, 1):
            for dx in (-1, 0, 1):
                k = (dy + 1) * 3 + (dx + 1)
                d = dy * W + dx
                rhs = xe[:, PAD + d:PAD + d + N]             # x shifted by d
                m = tap_mask[(dy, dx)]
                if m is not None:
                    rhs = rhs * m
                t = jnp.dot(w_ref[:, k * C:(k + 1) * C], rhs,
                            preferred_element_type=jnp.float32)
                acc = t if acc is None else acc + t
        return acc                                           # (C, N) f32

    def batchnorm(y, g_ref, b_ref):
        # Fused single-pass batch statistics (biased variance), f32 accum.
        mean = jnp.sum(y, axis=1, keepdims=True) * inv_n
        ms = jnp.sum(y * y, axis=1, keepdims=True) * inv_n
        var = ms - mean * mean
        scale = g_ref[...] * lax.rsqrt(var + eps)
        return (y - mean) * scale + b_ref[...]

    x = x_ref[...]
    # conv1 -> bn1 -> relu
    o1 = jnp.maximum(batchnorm(conv3x3_taps(x, w1_ref), g1_ref, b1_ref), 0.0)
    # conv2 -> bn2
    y2 = batchnorm(conv3x3_taps(o1, w2_ref), g2_ref, b2_ref)
    # + identity shortcut, relu, full-tile lane-dense store
    o_ref[...] = jnp.maximum(y2 + x, 0.0)


# ----------------------------------------------------------------------------
# Wrapper: NCHW in / NCHW out.  Only the channel-major transpose/reshape and
# tiny weight flattening happen outside the kernel (no jnp.pad, no padded-lane
# output strip, no activation round trips between the fused ops).
# ----------------------------------------------------------------------------
def _flatten_w(w_oihw):
    # (Cout, Cin, 3, 3) -> (Cout, 9*Cin), column index = (ky*3 + kx)*Cin + cin
    Cout, Cin, _, _ = w_oihw.shape
    return jnp.transpose(w_oihw, (0, 2, 3, 1)).reshape(Cout, 9 * Cin)


def basic_block_forward(x_nchw, params):
    B, Cin, H, W = x_nchw.shape
    Cout = params["w1"].shape[0]
    assert Cin == Cout, "identity-shortcut config requires in_planes == planes"
    assert (W & (W - 1)) == 0 and (H & (H - 1)) == 0, \
        "boundary masks use power-of-two H, W bit tricks"

    N = B * H * W
    # compact channel-major layout: row = channel, lane q = b*H*W + y*W + x
    x2d = jnp.transpose(x_nchw, (1, 0, 2, 3)).reshape(Cin, N).astype(jnp.float32)
    w1f = _flatten_w(params["w1"]).astype(jnp.float32)
    w2f = _flatten_w(params["w2"]).astype(jnp.float32)
    g1 = params["g1"].reshape(Cout, 1).astype(jnp.float32)
    b1 = params["b1"].reshape(Cout, 1).astype(jnp.float32)
    g2 = params["g2"].reshape(Cout, 1).astype(jnp.float32)
    b2 = params["b2"].reshape(Cout, 1).astype(jnp.float32)

    kernel = functools.partial(_basic_block_kernel,
                               H=H, W=W, C=Cout, N=N, eps=EPS)

    out2d = pl.pallas_call(
        kernel,
        out_shape=jax.ShapeDtypeStruct((Cout, N), jnp.float32),
        grid=(1,),
        in_specs=[
            pl.BlockSpec((Cin, N), lambda i: (0, 0)),
            pl.BlockSpec((Cout, 9 * Cin), lambda i: (0, 0)),
            pl.BlockSpec((Cout, 9 * Cout), lambda i: (0, 0)),
            pl.BlockSpec((Cout, 1), lambda i: (0, 0)),
            pl.BlockSpec((Cout, 1), lambda i: (0, 0)),
            pl.BlockSpec((Cout, 1), lambda i: (0, 0)),
            pl.BlockSpec((Cout, 1), lambda i: (0, 0)),
        ],
        out_specs=pl.BlockSpec((Cout, N), lambda i: (0, 0)),
        compiler_params=pltpu.CompilerParams(
            dimension_semantics=("arbitrary",)),
    )(x2d, w1f, w2f, g1, b1, g2, b2)

    # back to NCHW (pure layout op; a following fused block would consume the
    # compact channel-major layout directly and skip this)
    return out2d.reshape(Cout, B, H, W).transpose(1, 0, 2, 3)


# ----------------------------------------------------------------------------
# Pure-JAX reference (mirrors the PyTorch forward) for a numerical check.
# ----------------------------------------------------------------------------
def _ref_bn(y, g, b):
    mean = jnp.mean(y, axis=(0, 2, 3), keepdims=True)
    var = jnp.mean((y - mean) ** 2, axis=(0, 2, 3), keepdims=True)
    return g.reshape(1, -1, 1, 1) * (y - mean) * lax.rsqrt(var + EPS) \
        + b.reshape(1, -1, 1, 1)


def ref_forward(x, params):
    dn = ("NCHW", "OIHW", "NCHW")
    c1 = lax.conv_general_dilated(x, params["w1"], (1, 1), ((1, 1), (1, 1)),
                                  dimension_numbers=dn)
    o1 = jnp.maximum(_ref_bn(c1, params["g1"][0], params["b1"][0]), 0.0)
    c2 = lax.conv_general_dilated(o1, params["w2"], (1, 1), ((1, 1), (1, 1)),
                                  dimension_numbers=dn)
    o2 = _ref_bn(c2, params["g2"][0], params["b2"][0]) + x
    return jnp.maximum(o2, 0.0)


if __name__ == "__main__":
    in_planes, planes, stride = 4, 4, 1   # identity shortcut configuration
    B, H, W = 2, 16, 16

    key = jax.random.PRNGKey(0)
    k_x, k_w1, k_w2 = jax.random.split(key, 3)

    x = jax.random.normal(k_x, (B, in_planes, H, W), dtype=jnp.float32)

    fan_in = in_planes * 9
    params = {
        "w1": jax.random.normal(k_w1, (planes, in_planes, 3, 3), jnp.float32)
              * (2.0 / fan_in) ** 0.5,
        "w2": jax.random.normal(k_w2, (planes, planes, 3, 3), jnp.float32)
              * (2.0 / (planes * 9)) ** 0.5,
        "g1": jnp.ones((1, planes), jnp.float32),
        "b1": jnp.zeros((1, planes), jnp.float32),
        "g2": jnp.ones((1, planes), jnp.float32),
        "b2": jnp.zeros((1, planes), jnp.float32),
    }

    out = jax.block_until_ready(basic_block_forward(x, params))
    ref = jax.block_until_ready(ref_forward(x, params))

    assert out.shape == (B, planes, H, W), out.shape
    assert jnp.allclose(out, ref, rtol=1e-4, atol=1e-4), \
        f"max abs err {jnp.max(jnp.abs(out - ref))}"

    print("KERNEL_OK")
</pallas_src>

<mosaic_0001>
module attributes {stable_mosaic.version = 11 : i64} {
  func.func @_basic_block_kernel(%arg0: i32, %arg1: memref<4x512xf32, #tpu.memory_space<vmem>>, %arg2: memref<4x36xf32, #tpu.memory_space<vmem>>, %arg3: memref<4x36xf32, #tpu.memory_space<vmem>>, %arg4: memref<4x1xf32, #tpu.memory_space<vmem>>, %arg5: memref<4x1xf32, #tpu.memory_space<vmem>>, %arg6: memref<4x1xf32, #tpu.memory_space<vmem>>, %arg7: memref<4x1xf32, #tpu.memory_space<vmem>>, %arg8: memref<4x512xf32, #tpu.memory_space<vmem>>) attributes {dimension_semantics = [#tpu.dimension_semantics<arbitrary>], iteration_bounds = array<i64: 1>, scalar_prefetch = 0 : i64, scratch_operands = 0 : i64, tpu.core_type = #tpu.core_type<tc>, window_params = [{pipeline_mode = #tpu.pipeline_mode<synchronous>, transform_indices = @transform_0, window_bounds = array<i64: 4, 512>}, {pipeline_mode = #tpu.pipeline_mode<synchronous>, transform_indices = @transform_1, window_bounds = array<i64: 4, 36>}, {pipeline_mode = #tpu.pipeline_mode<synchronous>, transform_indices = @transform_2, window_bounds = array<i64: 4, 36>}, {pipeline_mode = #tpu.pipeline_mode<synchronous>, transform_indices = @transform_3, window_bounds = array<i64: 4, 1>}, {pipeline_mode = #tpu.pipeline_mode<synchronous>, transform_indices = @transform_4, window_bounds = array<i64: 4, 1>}, {pipeline_mode = #tpu.pipeline_mode<synchronous>, transform_indices = @transform_5, window_bounds = array<i64: 4, 1>}, {pipeline_mode = #tpu.pipeline_mode<synchronous>, transform_indices = @transform_6, window_bounds = array<i64: 4, 1>}, {pipeline_mode = #tpu.pipeline_mode<synchronous>, transform_indices = @transform_7, window_bounds = array<i64: 4, 512>}]} {
    %0 = tpu.iota {dimensions = array<i32: 1>} : vector<1x512xi32>
    %c15_i32 = arith.constant 15 : i32
    %1 = vector.broadcast %c15_i32 : i32 to vector<1x512xi32>
    %2 = arith.andi %0, %1 : vector<1x512xi32>
    %c255_i32 = arith.constant 255 : i32
    %3 = vector.broadcast %c255_i32 : i32 to vector<1x512xi32>
    %4 = arith.andi %0, %3 : vector<1x512xi32>
    %c4_i32 = arith.constant 4 : i32
    %5 = vector.broadcast %c4_i32 : i32 to vector<1x512xi32>
    %6 = arith.shrsi %4, %5 : vector<1x512xi32>
    %c1_i32 = arith.constant 1 : i32
    %7 = vector.broadcast %c1_i32 : i32 to vector<1x512xi32>
    %8 = arith.cmpi sge, %2, %7 : vector<1x512xi32>
    %9 = arith.extui %8 : vector<1x512xi1> to vector<1x512xi32>
    %10 = arith.sitofp %9 : vector<1x512xi32> to vector<1x512xf32>
    %c14_i32 = arith.constant 14 : i32
    %11 = vector.broadcast %c14_i32 : i32 to vector<1x512xi32>
    %12 = arith.cmpi sle, %2, %11 : vector<1x512xi32>
    %13 = arith.extui %12 : vector<1x512xi1> to vector<1x512xi32>
    %14 = arith.sitofp %13 : vector<1x512xi32> to vector<1x512xf32>
    %c1_i32_0 = arith.constant 1 : i32
    %15 = vector.broadcast %c1_i32_0 : i32 to vector<1x512xi32>
    %16 = arith.cmpi sge, %6, %15 : vector<1x512xi32>
    %17 = arith.extui %16 : vector<1x512xi1> to vector<1x512xi32>
    %18 = arith.sitofp %17 : vector<1x512xi32> to vector<1x512xf32>
    %c14_i32_1 = arith.constant 14 : i32
    %19 = vector.broadcast %c14_i32_1 : i32 to vector<1x512xi32>
    %20 = arith.cmpi sle, %6, %19 : vector<1x512xi32>
    %21 = arith.extui %20 : vector<1x512xi1> to vector<1x512xi32>
    %22 = arith.sitofp %21 : vector<1x512xi32> to vector<1x512xf32>
    %23 = arith.mulf %18, %10 : vector<1x512xf32>
    %24 = arith.mulf %18, %14 : vector<1x512xf32>
    %25 = arith.mulf %22, %10 : vector<1x512xf32>
    %26 = arith.mulf %22, %14 : vector<1x512xf32>
    %cst = arith.constant 0.000000e+00 : f32
    %27 = vector.broadcast %cst : f32 to vector<4x17xf32>
    %c0 = arith.constant 0 : index
    %c0_2 = arith.constant 0 : index
    %28 = vector.load %arg1[%c0, %c0_2] : memref<4x512xf32, #tpu.memory_space<vmem>>, vector<4x512xf32>
    %29 = tpu.concatenate %27, %28, %27 in 1 : vector<4x17xf32>, vector<4x512xf32>, vector<4x17xf32> -> vector<4x546xf32>
    %30 = vector.extract_strided_slice %29 {offsets = [0, 0], sizes = [4, 512], strides = [1, 1]} : vector<4x546xf32> to vector<4x512xf32>
    %31 = vector.broadcast %23 : vector<1x512xf32> to vector<4x512xf32>
    %32 = arith.mulf %30, %31 : vector<4x512xf32>
    %c0_3 = arith.constant 0 : index
    %c0_4 = arith.constant 0 : index
    %33 = vector.load %arg2[%c0_3, %c0_4] : memref<4x36xf32, #tpu.memory_space<vmem>>, vector<4x4xf32>
    %cst_5 = arith.constant dense<0.000000e+00> : vector<4x512xf32>
    %34 = tpu.matmul %33, %32, %cst_5 {dimension_numbers = #tpu.dot_dimension_numbers<[1], [0], [0], [1], [0, 0, 1, 1], [], []>} : vector<4x4xf32>, vector<4x512xf32>, vector<4x512xf32> -> vector<4x512xf32>
    %35 = vector.extract_strided_slice %29 {offsets = [0, 1], sizes = [4, 512], strides = [1, 1]} : vector<4x546xf32> to vector<4x512xf32>
    %36 = vector.broadcast %18 : vector<1x512xf32> to vector<4x512xf32>
    %37 = arith.mulf %35, %36 : vector<4x512xf32>
    %c0_6 = arith.constant 0 : index
    %c4 = arith.constant 4 : index
    %38 = vector.load %arg2[%c0_6, %c4] : memref<4x36xf32, #tpu.memory_space<vmem>>, vector<4x4xf32>
    %cst_7 = arith.constant dense<0.000000e+00> : vector<4x512xf32>
    %39 = tpu.matmul %38, %37, %cst_7 {dimension_numbers = #tpu.dot_dimension_numbers<[1], [0], [0], [1], [0, 0, 1, 1], [], []>} : vector<4x4xf32>, vector<4x512xf32>, vector<4x512xf32> -> vector<4x512xf32>
    %40 = arith.addf %34, %39 : vector<4x512xf32>
    %41 = vector.extract_strided_slice %29 {offsets = [0, 2], sizes = [4, 512], strides = [1, 1]} : vector<4x546xf32> to vector<4x512xf32>
    %42 = vector.broadcast %24 : vector<1x512xf32> to vector<4x512xf32>
    %43 = arith.mulf %41, %42 : vector<4x512xf32>
    %c0_8 = arith.constant 0 : index
    %c8 = arith.constant 8 : index
    %44 = vector.load %arg2[%c0_8, %c8] : memref<4x36xf32, #tpu.memory_space<vmem>>, vector<4x4xf32>
    %cst_9 = arith.constant dense<0.000000e+00> : vector<4x512xf32>
    %45 = tpu.matmul %44, %43, %cst_9 {dimension_numbers = #tpu.dot_dimension_numbers<[1], [0], [0], [1], [0, 0, 1, 1], [], []>} : vector<4x4xf32>, vector<4x512xf32>, vector<4x512xf32> -> vector<4x512xf32>
    %46 = arith.addf %40, %45 : vector<4x512xf32>
    %47 = vector.extract_strided_slice %29 {offsets = [0, 16], sizes = [4, 512], strides = [1, 1]} : vector<4x546xf32> to vector<4x512xf32>
    %48 = vector.broadcast %10 : vector<1x512xf32> to vector<4x512xf32>
    %49 = arith.mulf %47, %48 : vector<4x512xf32>
    %c0_10 = arith.constant 0 : index
    %c12 = arith.constant 12 : index
    %50 = vector.load %arg2[%c0_10, %c12] : memref<4x36xf32, #tpu.memory_space<vmem>>, vector<4x4xf32>
    %cst_11 = arith.constant dense<0.000000e+00> : vector<4x512xf32>
    %51 = tpu.matmul %50, %49, %cst_11 {dimension_numbers = #tpu.dot_dimension_numbers<[1], [0], [0], [1], [0, 0, 1, 1], [], []>} : vector<4x4xf32>, vector<4x512xf32>, vector<4x512xf32> -> vector<4x512xf32>
    %52 = arith.addf %46, %51 : vector<4x512xf32>
    %53 = vector.extract_strided_slice %29 {offsets = [0, 17], sizes = [4, 512], strides = [1, 1]} : vector<4x546xf32> to vector<4x512xf32>
    %c0_12 = arith.constant 0 : index
    %c16 = arith.constant 16 : index
    %54 = vector.load %arg2[%c0_12, %c16] : memref<4x36xf32, #tpu.memory_space<vmem>>, vector<4x4xf32>
    %cst_13 = arith.constant dense<0.000000e+00> : vector<4x512xf32>
    %55 = tpu.matmul %54, %53, %cst_13 {dimension_numbers = #tpu.dot_dimension_numbers<[1], [0], [0], [1], [0, 0, 1, 1], [], []>} : vector<4x4xf32>, vector<4x512xf32>, vector<4x512xf32> -> vector<4x512xf32>
    %56 = arith.addf %52, %55 : vector<4x512xf32>
    %57 = vector.extract_strided_slice %29 {offsets = [0, 18], sizes = [4, 512], strides = [1, 1]} : vector<4x546xf32> to vector<4x512xf32>
    %58 = vector.broadcast %14 : vector<1x512xf32> to vector<4x512xf32>
    %59 = arith.mulf %57, %58 : vector<4x512xf32>
    %c0_14 = arith.constant 0 : index
    %c20 = arith.constant 20 : index
    %60 = vector.load %arg2[%c0_14, %c20] : memref<4x36xf32, #tpu.memory_space<vmem>>, vector<4x4xf32>
    %cst_15 = arith.constant dense<0.000000e+00> : vector<4x512xf32>
    %61 = tpu.matmul %60, %59, %cst_15 {dimension_numbers = #tpu.dot_dimension_numbers<[1], [0], [0], [1], [0, 0, 1, 1], [], []>} : vector<4x4xf32>, vector<4x512xf32>, vector<4x512xf32> -> vector<4x512xf32>
    %62 = arith.addf %56, %61 : vector<4x512xf32>
    %63 = vector.extract_strided_slice %29 {offsets = [0, 32], sizes = [4, 512], strides = [1, 1]} : vector<4x546xf32> to vector<4x512xf32>
    %64 = vector.broadcast %25 : vector<1x512xf32> to vector<4x512xf32>
    %65 = arith.mulf %63, %64 : vector<4x512xf32>
    %c0_16 = arith.constant 0 : index
    %c24 = arith.constant 24 : index
    %66 = vector.load %arg2[%c0_16, %c24] : memref<4x36xf32, #tpu.memory_space<vmem>>, vector<4x4xf32>
    %cst_17 = arith.constant dense<0.000000e+00> : vector<4x512xf32>
    %67 = tpu.matmul %66, %65, %cst_17 {dimension_numbers = #tpu.dot_dimension_numbers<[1], [0], [0], [1], [0, 0, 1, 1], [], []>} : vector<4x4xf32>, vector<4x512xf32>, vector<4x512xf32> -> vector<4x512xf32>
    %68 = arith.addf %62, %67 : vector<4x512xf32>
    %69 = vector.extract_strided_slice %29 {offsets = [0, 33], sizes = [4, 512], strides = [1, 1]} : vector<4x546xf32> to vector<4x512xf32>
    %70 = vector.broadcast %22 : vector<1x512xf32> to vector<4x512xf32>
    %71 = arith.mulf %69, %70 : vector<4x512xf32>
    %c0_18 = arith.constant 0 : index
    %c28 = arith.constant 28 : index
    %72 = vector.load %arg2[%c0_18, %c28] : memref<4x36xf32, #tpu.memory_space<vmem>>, vector<4x4xf32>
    %cst_19 = arith.constant dense<0.000000e+00> : vector<4x512xf32>
    %73 = tpu.matmul %72, %71, %cst_19 {dimension_numbers = #tpu.dot_dimension_numbers<[1], [0], [0], [1], [0, 0, 1, 1], [], []>} : vector<4x4xf32>, vector<4x512xf32>, vector<4x512xf32> -> vector<4x512xf32>
    %74 = arith.addf %68, %73 : vector<4x512xf32>
    %75 = vector.extract_strided_slice %29 {offsets = [0, 34], sizes = [4, 512], strides = [1, 1]} : vector<4x546xf32> to vector<4x512xf32>
    %76 = vector.broadcast %26 : vector<1x512xf32> to vector<4x512xf32>
    %77 = arith.mulf %75, %76 : vector<4x512xf32>
    %c0_20 = arith.constant 0 : index
    %c32 = arith.constant 32 : index
    %78 = vector.load %arg2[%c0_20, %c32] : memref<4x36xf32, #tpu.memory_space<vmem>>, vector<4x4xf32>
    %cst_21 = arith.constant dense<0.000000e+00> : vector<4x512xf32>
    %79 = tpu.matmul %78, %77, %cst_21 {dimension_numbers = #tpu.dot_dimension_numbers<[1], [0], [0], [1], [0, 0, 1, 1], [], []>} : vector<4x4xf32>, vector<4x512xf32>, vector<4x512xf32> -> vector<4x512xf32>
    %80 = arith.addf %74, %79 : vector<4x512xf32>
    %cst_22 = arith.constant dense<0.000000e+00> : vector<4xf32>
    %81 = vector.multi_reduction <add>, %80, %cst_22 [1] : vector<4x512xf32> to vector<4xf32>
    %82 = vector.shape_cast %81 : vector<4xf32> to vector<4x1xf32>
    %cst_23 = arith.constant 0.001953125 : f32
    %83 = vector.broadcast %cst_23 : f32 to vector<4x1xf32>
    %84 = arith.mulf %82, %83 : vector<4x1xf32>
    %85 = arith.mulf %80, %80 : vector<4x512xf32>
    %cst_24 = arith.constant dense<0.000000e+00> : vector<4xf32>
    %86 = vector.multi_reduction <add>, %85, %cst_24 [1] : vector<4x512xf32> to vector<4xf32>
    %87 = vector.shape_cast %86 : vector<4xf32> to vector<4x1xf32>
    %cst_25 = arith.constant 0.001953125 : f32
    %88 = vector.broadcast %cst_25 : f32 to vector<4x1xf32>
    %89 = arith.mulf %87, %88 : vector<4x1xf32>
    %90 = arith.mulf %84, %84 : vector<4x1xf32>
    %91 = arith.subf %89, %90 : vector<4x1xf32>
    %c0_26 = arith.constant 0 : index
    %c0_27 = arith.constant 0 : index
    %92 = vector.load %arg4[%c0_26, %c0_27] : memref<4x1xf32, #tpu.memory_space<vmem>>, vector<4x1xf32>
    %cst_28 = arith.constant 9.99999974E-6 : f32
    %93 = vector.broadcast %cst_28 : f32 to vector<4x1xf32>
    %94 = arith.addf %91, %93 : vector<4x1xf32>
    %95 = math.rsqrt %94 : vector<4x1xf32>
    %96 = arith.mulf %92, %95 : vector<4x1xf32>
    %97 = vector.broadcast %84 : vector<4x1xf32> to vector<4x512xf32>
    %98 = arith.subf %80, %97 : vector<4x512xf32>
    %99 = vector.broadcast %96 : vector<4x1xf32> to vector<4x512xf32>
    %100 = arith.mulf %98, %99 : vector<4x512xf32>
    %c0_29 = arith.constant 0 : index
    %c0_30 = arith.constant 0 : index
    %101 = vector.load %arg5[%c0_29, %c0_30] : memref<4x1xf32, #tpu.memory_space<vmem>>, vector<4x1xf32>
    %102 = vector.broadcast %101 : vector<4x1xf32> to vector<4x512xf32>
    %103 = arith.addf %100, %102 : vector<4x512xf32>
    %cst_31 = arith.constant 0.000000e+00 : f32
    %104 = vector.broadcast %cst_31 : f32 to vector<4x512xf32>
    %105 = arith.maximumf %103, %104 : vector<4x512xf32>
    %106 = tpu.concatenate %27, %105, %27 in 1 : vector<4x17xf32>, vector<4x512xf32>, vector<4x17xf32> -> vector<4x546xf32>
    %107 = vector.extract_strided_slice %106 {offsets = [0, 0], sizes = [4, 512], strides = [1, 1]} : vector<4x546xf32> to vector<4x512xf32>
    %108 = vector.broadcast %23 : vector<1x512xf32> to vector<4x512xf32>
    %109 = arith.mulf %107, %108 : vector<4x512xf32>
    %c0_32 = arith.constant 0 : index
    %c0_33 = arith.constant 0 : index
    %110 = vector.load %arg3[%c0_32, %c0_33] : memref<4x36xf32, #tpu.memory_space<vmem>>, vector<4x4xf32>
    %cst_34 = arith.constant dense<0.000000e+00> : vector<4x512xf32>
    %111 = tpu.matmul %110, %109, %cst_34 {dimension_numbers = #tpu.dot_dimension_numbers<[1], [0], [0], [1], [0, 0, 1, 1], [], []>} : vector<4x4xf32>, vector<4x512xf32>, vector<4x512xf32> -> vector<4x512xf32>
    %112 = vector.extract_strided_slice %106 {offsets = [0, 1], sizes = [4, 512], strides = [1, 1]} : vector<4x546xf32> to vector<4x512xf32>
    %113 = vector.broadcast %18 : vector<1x512xf32> to vector<4x512xf32>
    %114 = arith.mulf %112, %113 : vector<4x512xf32>
    %c0_35 = arith.constant 0 : index
    %c4_36 = arith.constant 4 : index
    %115 = vector.load %arg3[%c0_35, %c4_36] : memref<4x36xf32, #tpu.memory_space<vmem>>, vector<4x4xf32>
    %cst_37 = arith.constant dense<0.000000e+00> : vector<4x512xf32>
    %116 = tpu.matmul %115, %114, %cst_37 {dimension_numbers = #tpu.dot_dimension_numbers<[1], [0], [0], [1], [0, 0, 1, 1], [], []>} : vector<4x4xf32>, vector<4x512xf32>, vector<4x512xf32> -> vector<4x512xf32>
    %117 = arith.addf %111, %116 : vector<4x512xf32>
    %118 = vector.extract_strided_slice %106 {offsets = [0, 2], sizes = [4, 512], strides = [1, 1]} : vector<4x546xf32> to vector<4x512xf32>
    %119 = vector.broadcast %24 : vector<1x512xf32> to vector<4x512xf32>
    %120 = arith.mulf %118, %119 : vector<4x512xf32>
    %c0_38 = arith.constant 0 : index
    %c8_39 = arith.constant 8 : index
    %121 = vector.load %arg3[%c0_38, %c8_39] : memref<4x36xf32, #tpu.memory_space<vmem>>, vector<4x4xf32>
    %cst_40 = arith.constant dense<0.000000e+00> : vector<4x512xf32>
    %122 = tpu.matmul %121, %120, %cst_40 {dimension_numbers = #tpu.dot_dimension_numbers<[1], [0], [0], [1], [0, 0, 1, 1], [], []>} : vector<4x4xf32>, vector<4x512xf32>, vector<4x512xf32> -> vector<4x512xf32>
    %123 = arith.addf %117, %122 : vector<4x512xf32>
    %124 = vector.extract_strided_slice %106 {offsets = [0, 16], sizes = [4, 512], strides = [1, 1]} : vector<4x546xf32> to vector<4x512xf32>
    %125 = vector.broadcast %10 : vector<1x512xf32> to vector<4x512xf32>
    %126 = arith.mulf %124, %125 : vector<4x512xf32>
    %c0_41 = arith.constant 0 : index
    %c12_42 = arith.constant 12 : index
    %127 = vector.load %arg3[%c0_41, %c12_42] : memref<4x36xf32, #tpu.memory_space<vmem>>, vector<4x4xf32>
    %cst_43 = arith.constant dense<0.000000e+00> : vector<4x512xf32>
    %128 = tpu.matmul %127, %126, %cst_43 {dimension_numbers = #tpu.dot_dimension_numbers<[1], [0], [0], [1], [0, 0, 1, 1], [], []>} : vector<4x4xf32>, vector<4x512xf32>, vector<4x512xf32> -> vector<4x512xf32>
    %129 = arith.addf %123, %128 : vector<4x512xf32>
    %130 = vector.extract_strided_slice %106 {offsets = [0, 17], sizes = [4, 512], strides = [1, 1]} : vector<4x546xf32> to vector<4x512xf32>
    %c0_44 = arith.constant 0 : index
    %c16_45 = arith.constant 16 : index
    %131 = vector.load %arg3[%c0_44, %c16_45] : memref<4x36xf32, #tpu.memory_space<vmem>>, vector<4x4xf32>
    %cst_46 = arith.constant dense<0.000000e+00> : vector<4x512xf32>
    %132 = tpu.matmul %131, %130, %cst_46 {dimension_numbers = #tpu.dot_dimension_numbers<[1], [0], [0], [1], [0, 0, 1, 1], [], []>} : vector<4x4xf32>, vector<4x512xf32>, vector<4x512xf32> -> vector<4x512xf32>
    %133 = arith.addf %129, %132 : vector<4x512xf32>
    %134 = vector.extract_strided_slice %106 {offsets = [0, 18], sizes = [4, 512], strides = [1, 1]} : vector<4x546xf32> to vector<4x512xf32>
    %135 = vector.broadcast %14 : vector<1x512xf32> to vector<4x512xf32>
    %136 = arith.mulf %134, %135 : vector<4x512xf32>
    %c0_47 = arith.constant 0 : index
    %c20_48 = arith.constant 20 : index
    %137 = vector.load %arg3[%c0_47, %c20_48] : memref<4x36xf32, #tpu.memory_space<vmem>>, vector<4x4xf32>
    %cst_49 = arith.constant dense<0.000000e+00> : vector<4x512xf32>
    %138 = tpu.matmul %137, %136, %cst_49 {dimension_numbers = #tpu.dot_dimension_numbers<[1], [0], [0], [1], [0, 0, 1, 1], [], []>} : vector<4x4xf32>, vector<4x512xf32>, vector<4x512xf32> -> vector<4x512xf32>
    %139 = arith.addf %133, %138 : vector<4x512xf32>
    %140 = vector.extract_strided_slice %106 {offsets = [0, 32], sizes = [4, 512], strides = [1, 1]} : vector<4x546xf32> to vector<4x512xf32>
    %141 = vector.broadcast %25 : vector<1x512xf32> to vector<4x512xf32>
    %142 = arith.mulf %140, %141 : vector<4x512xf32>
    %c0_50 = arith.constant 0 : index
    %c24_51 = arith.constant 24 : index
    %143 = vector.load %arg3[%c0_50, %c24_51] : memref<4x36xf32, #tpu.memory_space<vmem>>, vector<4x4xf32>
    %cst_52 = arith.constant dense<0.000000e+00> : vector<4x512xf32>
    %144 = tpu.matmul %143, %142, %cst_52 {dimension_numbers = #tpu.dot_dimension_numbers<[1], [0], [0], [1], [0, 0, 1, 1], [], []>} : vector<4x4xf32>, vector<4x512xf32>, vector<4x512xf32> -> vector<4x512xf32>
    %145 = arith.addf %139, %144 : vector<4x512xf32>
    %146 = vector.extract_strided_slice %106 {offsets = [0, 33], sizes = [4, 512], strides = [1, 1]} : vector<4x546xf32> to vector<4x512xf32>
    %147 = vector.broadcast %22 : vector<1x512xf32> to vector<4x512xf32>
    %148 = arith.mulf %146, %147 : vector<4x512xf32>
    %c0_53 = arith.constant 0 : index
    %c28_54 = arith.constant 28 : index
    %149 = vector.load %arg3[%c0_53, %c28_54] : memref<4x36xf32, #tpu.memory_space<vmem>>, vector<4x4xf32>
    %cst_55 = arith.constant dense<0.000000e+00> : vector<4x512xf32>
    %150 = tpu.matmul %149, %148, %cst_55 {dimension_numbers = #tpu.dot_dimension_numbers<[1], [0], [0], [1], [0, 0, 1, 1], [], []>} : vector<4x4xf32>, vector<4x512xf32>, vector<4x512xf32> -> vector<4x512xf32>
    %151 = arith.addf %145, %150 : vector<4x512xf32>
    %152 = vector.extract_strided_slice %106 {offsets = [0, 34], sizes = [4, 512], strides = [1, 1]} : vector<4x546xf32> to vector<4x512xf32>
    %153 = vector.broadcast %26 : vector<1x512xf32> to vector<4x512xf32>
    %154 = arith.mulf %152, %153 : vector<4x512xf32>
    %c0_56 = arith.constant 0 : index
    %c32_57 = arith.constant 32 : index
    %155 = vector.load %arg3[%c0_56, %c32_57] : memref<4x36xf32, #tpu.memory_space<vmem>>, vector<4x4xf32>
    %cst_58 = arith.constant dense<0.000000e+00> : vector<4x512xf32>
    %156 = tpu.matmul %155, %154, %cst_58 {dimension_numbers = #tpu.dot_dimension_numbers<[1], [0], [0], [1], [0, 0, 1, 1], [], []>} : vector<4x4xf32>, vector<4x512xf32>, vector<4x512xf32> -> vector<4x512xf32>
    %157 = arith.addf %151, %156 : vector<4x512xf32>
    %cst_59 = arith.constant dense<0.000000e+00> : vector<4xf32>
    %158 = vector.multi_reduction <add>, %157, %cst_59 [1] : vector<4x512xf32> to vector<4xf32>
    %159 = vector.shape_cast %158 : vector<4xf32> to vector<4x1xf32>
    %cst_60 = arith.constant 0.001953125 : f32
    %160 = vector.broadcast %cst_60 : f32 to vector<4x1xf32>
    %161 = arith.mulf %159, %160 : vector<4x1xf32>
    %162 = arith.mulf %157, %157 : vector<4x512xf32>
    %cst_61 = arith.constant dense<0.000000e+00> : vector<4xf32>
    %163 = vector.multi_reduction <add>, %162, %cst_61 [1] : vector<4x512xf32> to vector<4xf32>
    %164 = vector.shape_cast %163 : vector<4xf32> to vector<4x1xf32>
    %cst_62 = arith.constant 0.001953125 : f32
    %165 = vector.broadcast %cst_62 : f32 to vector<4x1xf32>
    %166 = arith.mulf %164, %165 : vector<4x1xf32>
    %167 = arith.mulf %161, %161 : vector<4x1xf32>
    %168 = arith.subf %166, %167 : vector<4x1xf32>
    %c0_63 = arith.constant 0 : index
    %c0_64 = arith.constant 0 : index
    %169 = vector.load %arg6[%c0_63, %c0_64] : memref<4x1xf32, #tpu.memory_space<vmem>>, vector<4x1xf32>
    %cst_65 = arith.constant 9.99999974E-6 : f32
    %170 = vector.broadcast %cst_65 : f32 to vector<4x1xf32>
    %171 = arith.addf %168, %170 : vector<4x1xf32>
    %172 = math.rsqrt %171 : vector<4x1xf32>
    %173 = arith.mulf %169, %172 : vector<4x1xf32>
    %174 = vector.broadcast %161 : vector<4x1xf32> to vector<4x512xf32>
    %175 = arith.subf %157, %174 : vector<4x512xf32>
    %176 = vector.broadcast %173 : vector<4x1xf32> to vector<4x512xf32>
    %177 = arith.mulf %175, %176 : vector<4x512xf32>
    %c0_66 = arith.constant 0 : index
    %c0_67 = arith.constant 0 : index
    %178 = vector.load %arg7[%c0_66, %c0_67] : memref<4x1xf32, #tpu.memory_space<vmem>>, vector<4x1xf32>
    %179 = vector.broadcast %178 : vector<4x1xf32> to vector<4x512xf32>
    %180 = arith.addf %177, %179 : vector<4x512xf32>
    %181 = arith.addf %180, %28 : vector<4x512xf32>
    %cst_68 = arith.constant 0.000000e+00 : f32
    %182 = vector.broadcast %cst_68 : f32 to vector<4x512xf32>
    %183 = arith.maximumf %181, %182 : vector<4x512xf32>
    %c0_69 = arith.constant 0 : index
    %c0_70 = arith.constant 0 : index
    %184 = vector.load %arg8[%c0_69, %c0_70] : memref<4x512xf32, #tpu.memory_space<vmem>>, vector<4x512xf32>
    tpu.vector_store %arg8[%c0_69, %c0_70], %183 {strides = array<i32>} : memref<4x512xf32, #tpu.memory_space<vmem>>, vector<4x512xf32>,
    return
  }
  func.func @transform_0(%arg0: i32) -> (i32, i32) {
    %c0_i32 = arith.constant 0 : i32
    %c0_i32_0 = arith.constant 0 : i32
    %c0_i32_1 = arith.constant 0 : i32
    return %c0_i32, %c0_i32_0 : i32, i32
  }
  func.func @transform_1(%arg0: i32) -> (i32, i32) {
    %c0_i32 = arith.constant 0 : i32
    %c0_i32_0 = arith.constant 0 : i32
    %c0_i32_1 = arith.constant 0 : i32
    return %c0_i32, %c0_i32_0 : i32, i32
  }
  func.func @transform_2(%arg0: i32) -> (i32, i32) {
    %c0_i32 = arith.constant 0 : i32
    %c0_i32_0 = arith.constant 0 : i32
    %c0_i32_1 = arith.constant 0 : i32
    return %c0_i32, %c0_i32_0 : i32, i32
  }
  func.func @transform_3(%arg0: i32) -> (i32, i32) {
    %c0_i32 = arith.constant 0 : i32
    %c0_i32_0 = arith.constant 0 : i32
    %c0_i32_1 = arith.constant 0 : i32
    return %c0_i32, %c0_i32_0 : i32, i32
  }
  func.func @transform_4(%arg0: i32) -> (i32, i32) {
    %c0_i32 = arith.constant 0 : i32
    %c0_i32_0 = arith.constant 0 : i32
    %c0_i32_1 = arith.constant 0 : i32
    return %c0_i32, %c0_i32_0 : i32, i32
  }
  func.func @transform_5(%arg0: i32) -> (i32, i32) {
    %c0_i32 = arith.constant 0 : i32
    %c0_i32_0 = arith.constant 0 : i32
    %c0_i32_1 = arith.constant 0 : i32
    return %c0_i32, %c0_i32_0 : i32, i32
  }
  func.func @transform_6(%arg0: i32) -> (i32, i32) {
    %c0_i32 = arith.constant 0 : i32
    %c0_i32_0 = arith.constant 0 : i32
    %c0_i32_1 = arith.constant 0 : i32
    return %c0_i32, %c0_i32_0 : i32, i32
  }
  func.func @transform_7(%arg0: i32) -> (i32, i32) {
    %c0_i32 = arith.constant 0 : i32
    %c0_i32_0 = arith.constant 0 : i32
    %c0_i32_1 = arith.constant 0 : i32
    return %c0_i32, %c0_i32_0 : i32, i32
  }
}

</mosaic_0001>

<bundles_post_ra>
// kernel: tpu_custom_call.1
= control target key start
LH: loop header
LB: loop body
LE: loop exit
PB: predicated region body
PF: predicated region fallthrough
CT: control target
= control target key end

     0   :  { %12 = vsyncpa [#allocation3], 0  ;;  %s3867_s0 = inlined_call_operand.hbm [shape: f32[4,512], index: 0, kind: input, shape index: {}]   ;;  %s3868_s1 = inlined_call_operand.vmem [shape: f32[4,36], index: 1, kind: input, shape index: {}]   ;;  %s3869_s2 = inlined_call_operand.vmem [shape: f32[4,36], index: 2, kind: input, shape index: {}]   ;;  %s3870_s3 = inlined_call_operand.vmem [shape: f32[4,1], index: 3, kind: input, shape index: {}]   ;;  %s3871_s4 = inlined_call_operand.vmem [shape: f32[4,1], index: 4, kind: input, shape index: {}]   ;;  %s3872_s5 = inlined_call_operand.vmem [shape: f32[4,1], index: 5, kind: input, shape index: {}]   ;;  %s3873_s6 = inlined_call_operand.vmem [shape: f32[4,1], index: 6, kind: input, shape index: {}]   ;;  %s3874_s7 = inlined_call_operand.hbm [shape: f32[4,512], index: 7, kind: output, shape index: {}]  }
   0x1   :  { %13 = vsyncpa [#allocation4], 0  ;;  %s19_s26 = sshll.u32 %s3867_s0, 4  ;;  %s2887_s27 = smov [#allocation2]   ;;  %s20_s26 = int_to_ptr.hbm [resolvable:$true] %s19_s26 }
   0x2   :  { %s21_s28 = sshll.u32 %s2887_s27, 4  ;;  %s22_s28 = int_to_ptr.vmem [resolvable:$true] %s21_s28 }
   0x3   :  { %24 = dma.hbm_to_vmem [thread:$0]  %s20_s26, 256, %s22_s28, [#allocation3]  }
   0x4   :  { %2883 = dma.done.wait [#allocation3], 256  }
   0x5   :  { %2884 = vsyncadd [#allocation3], 4294967040  ;;  %v41_v0 = vlaneseq  ;;  %v122_v13 = vld [vmem:[#allocation2] sm:$0xff]  ;;  %v123_v14 = vld [vmem:[#allocation2 + $0x8] sm:$0xff]  ;;  %v2888_v18 = vmov 0.0   ;;  %s2889_s0 = smov 1  }
   0x6   :  { %126 = vst [vmem:[#allocation1] ss:$2 sm:$0xff] %v122_v13  ;;  %s2890_s29 = smov 2   ;;  %s2891_s30 = smov 17   ;;  %v3035_v51 = vld [vmem:[%s3868_s1] sm:$0xf] }
   0x7   :  { %v42_v1 = vand.u32 127, %v41_v0  ;;  %128 = vst [vmem:[#allocation1 + $0x10] ss:$2 sm:$0xff] %v123_v14  ;;  %s2892_s8 = smov 16   ;;  %s2893_s9 = smov 18  }
   0x8   :  { %s2894_s10 = smov 32   ;;  %s2895_s13 = smov 124  }
   0x9   :  { %v45_v2 = vadd.s32 384, %v42_v1  ;;  %v50_v3 = vand.u32 255, %v42_v1  ;;  %v43_v4 = vadd.s32 128, %v42_v1  ;;  %v44_v5 = vadd.s32 256, %v42_v1  ;;  %s2896_s1 = smov 34   ;;  %s2897_s14 = smov 33  }
   0xa   :  { %v46_v35 = vand.u32 15, %v42_v1  ;;  %s2898_s15 = smov 112   ;;  %s2899_s16 = smov 120  }
   0xb   :  { %v53_v6 = vand.u32 255, %v45_v2  ;;  %v2956_v7 = vshra.s32 %v50_v3, 4  ;;  %v51_v8 = vand.u32 255, %v43_v4  ;;  %v52_v9 = vand.u32 255, %v44_v5  ;;  %s2900_s17 = smov 108   ;;  %s2901_s18 = smov 116  }
   0xc   :  { %v47_v10 = vand.u32 15, %v43_v4  ;;  %v49_v11 = vand.u32 15, %v45_v2  ;;  %v48_v12 = vand.u32 15, %v44_v5  ;;  %vm58_vm9 = vcmp.ge.s32.totalorder %v46_v35, 1  ;;  %s2902_s19 = smov 111   ;;  %s2903_s20 = smov 127  }
   0xd   :  { %v2958_v15 = vshra.s32 %v53_v6, 4  ;;  %vm82_vm0 = vcmp.ge.s32.totalorder %v2956_v7, 1  ;;  %v55_v16 = vshra.s32 %v51_v8, 4  ;;  %v2961_v17 = vshra.s32 %v52_v9, 4  ;;  %s2904_s21 = smov 126   ;;  %s2905_s22 = smov 110  }
   0xe   :  { %v2964_v19 = vsel %vm82_vm0, 1.0, %v2888_v18  ;;  %vm71_vm1 = vcmp.le.s32.totalorder %v47_v10, 14  ;;  %vm73_vm5 = vcmp.le.s32.totalorder %v49_v11, 14  ;;  %vm72_vm6 = vcmp.le.s32.totalorder %v48_v12, 14  ;;  %s2906_s23 = smov 96   ;;  %s2907_s24 = smov 104  }
   0xf   :  { %vm85_vm2 = vcmp.ge.s32.totalorder %v2958_v15, 1  ;;  %vm83_vm3 = vcmp.ge.s32.totalorder %v55_v16, 1  ;;  %vm84_vm4 = vcmp.ge.s32.totalorder %v2961_v17, 1  ;;  %v2969_v20 = vsel %vm71_vm1, 1.0, %v2888_v18  ;;  %s2908_s25 = smov 95   ;;  %s2909_s26 = smov 100  }
  0x10   :  { %v2972_v21 = vsel %vm85_vm2, 1.0, %v2888_v18  ;;  %v2975_v22 = vsel %vm83_vm3, 1.0, %v2888_v18  ;;  %v2978_v23 = vsel %vm84_vm4, 1.0, %v2888_v18  ;;  %v2988_v27 = vsel %vm73_vm5, 1.0, %v2888_v18  ;;  %s2910_s27 = smov 94  }
  0x11   :  { %v2794_v24 = vpack.i.bf16 %v2964_v19, %v2972_v21  ;;  %v2789_v25 = vpack.i.bf16 %v2978_v23, %v2975_v22  ;;  %v111_v26 = vmul.f32 %v2975_v22, %v2969_v20  ;;  %v2991_v28 = vsel %vm72_vm6, 1.0, %v2888_v18  ;;  %v130_v29 = vld.sshfl [vmem:[#allocation1 + $0x8] sm:$0xff pattern:$0x75316420] }
  0x12   :  { %v132_v30 = vld.sshfl [vmem:[#allocation1 + $0x18] sm:$0xff pattern:$0x75316420]  ;;  %v131_v31 = vld.sshfl [vmem:[#allocation1 + $0x10] sm:$0xff pattern:$0x75316420]  ;;  %v113_v33 = vmul.f32 %v2972_v21, %v2988_v27  ;;  %v112_v34 = vmul.f32 %v2978_v23, %v2991_v28  ;;  %v2809_v47 = vpack.i.bf16 %v2991_v28, %v2969_v20 }
  0x13   :  { %2795 = vrot.lane.b32.xlu2 %v2794_v24, %s2889_s0  ;;  %2790 = vrot.lane.b32.xlu1 %v2789_v25, %s2889_s0  ;;  %2557 = vst [vmem:[#allocation1 + $0x10] ss:$2 sm:$0xff] %v123_v14  ;;  %v129_v32 = vld.sshfl [vmem:[#allocation1] sm:$0xff pattern:$0x75316420]  ;;  %vm59_vm7 = vcmp.ge.s32.totalorder %v47_v10, 1 }
  0x14   :  { %398 = vrot.lane.b32.xlu0 %v111_v26, %s2890_s29  ;;  %2555 = vst [vmem:[#allocation1] ss:$2 sm:$0xff] %v122_v13  ;;  %vm60_vm8 = vcmp.ge.s32.totalorder %v48_v12, 1  ;;  %vm61_vm10 = vcmp.ge.s32.totalorder %v49_v11, 1  ;;  %vm70_vm11 = vcmp.le.s32.totalorder %v46_v35, 14  ;;  %v3004_v36 = vsel %vm59_vm7, 1.0, %v2888_v18 }
  0x15   :  { %v3007_v37 = vsel %vm60_vm8, 1.0, %v2888_v18  ;;  %v3010_v38 = vsel %vm58_vm9, 1.0, %v2888_v18  ;;  %v3013_v39 = vsel %vm61_vm10, 1.0, %v2888_v18  ;;  %v2607_v40 = vsel %vm70_vm11, 1.0, %v2888_v18 }
  0x16   :  { %v2799_v41 = vpack.i.bf16 %v3007_v37, %v3004_v36  ;;  %v2804_v42 = vpack.i.bf16 %v3010_v38, %v3013_v39  ;;  %v110_v43 = vmul.f32 %v2964_v19, %v2607_v40  ;;  %vm95_vm12 = vcmp.le.s32.totalorder %v55_v16, 14 }
  0x17   :  { %v2616_v44 = vsel %vm95_vm12, 1.0, %v2888_v18  ;;  %v2814_v45 = vpack.i.bf16 %v2607_v40, %v2988_v27  ;;  %vm94_vm13 = vcmp.le.s32.totalorder %v2956_v7, 14  ;;  %vm96_vm14 = vcmp.le.s32.totalorder %v2961_v17, 14 }
  0x18   :  { %v115_v46 = vmul.f32 %v2616_v44, %v3004_v36  ;;  %v2615_v48 = vsel %vm94_vm13, 1.0, %v2888_v18  ;;  %v2617_v49 = vsel %vm96_vm14, 1.0, %v2888_v18  ;;  %vm97_vm15 = vcmp.le.s32.totalorder %v2958_v15, 14 }
  0x19   :  { %v114_v50 = vmul.f32 %v2615_v48, %v3010_v38  ;;  %v116_v52 = vmul.f32 %v2617_v49, %v3007_v37  ;;  %v2618_v53 = vsel %vm97_vm15, 1.0, %v2888_v18  ;;  %v119_v55 = vmul.f32 %v2616_v44, %v2969_v20 }
  0x1a   :  { %v117_v54 = vmul.f32 %v2618_v53, %v3013_v39  ;;  %v2819_v56 = vpack.i.bf16 %v2617_v49, %v2616_v44  ;;  %v2824_v57 = vpack.i.bf16 %v2615_v48, %v2618_v53  ;;  %v120_v58 = vmul.f32 %v2617_v49, %v2991_v28 }
  0x1b   :  { %402 = vrot.lane.b32.xlu2 %v113_v33, %s2890_s29  ;;  %400 = vrot.lane.b32.xlu1 %v112_v34, %s2890_s29  ;;  %v118_v59 = vmul.f32 %v2615_v48, %v2607_v40  ;;  %v121_v60 = vmul.f32 %v2618_v53, %v2988_v27  ;;  %vm141_vm0 = vcmask 138240   ;;  %vm169_vm1 = vcmask 7168  }
  0x1c   :  { %135 = vrot.lane.b32.xlu0 %v130_v29, %s2891_s30  ;;  %vm404_vm2 = vcmask 15360   ;;  %vm546_vm3 = vcmask 130048   ;;  %vm801_vm4 = vcmask 146432   ;;  %vm943_vm5 = vcmask 261120  }
  0x1d   :  { %vm1085_vm6 = vcmask 269312   ;;  %vm1227_vm7 = vcmask 277504   ;;  %vm201_vm8 = vcmask 1039360   ;;  %vm209_vm9 = vcmask 1043456  }
  0x1e   :  { %vm206_vm10 = vcmask 31744   ;;  %vm435_vm11 = vcmask 1031168   ;;  %vm577_vm12 = vcmask 916480   ;;  %vm690_vm13 = vcmask 908288  }
  0x1f   :  { %vm832_vm14 = vcmask 900096   ;;  %vm974_vm15 = vcmask 785408  }
  0x23   :  { %139 = vrot.lane.b32.xlu1 %v132_v30, %s2891_s30  ;;  %133 = vrot.lane.b32.xlu2 %v129_v32, %s2891_s30 }
  0x24   :  { %137 = vrot.lane.b32.xlu0 %v131_v31, %s2891_s30 }
  0x2b   :  { %2800 = vrot.lane.b32.xlu1 %v2799_v41, %s2892_s8  ;;  %2805 = vrot.lane.b32.xlu2 %v2804_v42, %s2892_s8 }
  0x2c   :  { %396 = vrot.lane.b32.xlu0 %v110_v43, %s2890_s29 }
  0x33   :  { %2815 = vrot.lane.b32.xlu1 %v2814_v45, %s2893_s9  ;;  %937 = vrot.lane.b32.xlu2 %v115_v46, %s2894_s10 }
  0x34   :  { %2810 = vrot.lane.b32.xlu0 %v2809_v47, %s2893_s9 }
  0x3b   :  { %184 = vrot.lane.b32.xlu1 %v3035_v51, %s2895_s13  ;;  %935 = vrot.lane.b32.xlu2 %v114_v50, %s2894_s10 }
  0x3c   :  { %939 = vrot.lane.b32.xlu0 %v116_v52, %s2894_s10 }
  0x43   :  { %941 = vrot.lane.b32.xlu1 %v117_v54, %s2894_s10  ;;  %1221 = vrot.lane.b32.xlu2 %v119_v55, %s2896_s1 }
  0x44   :  { %2820 = vrot.lane.b32.xlu0 %v2819_v56, %s2897_s14 }
  0x4b   :  { %2825 = vrot.lane.b32.xlu1 %v2824_v57, %s2897_s14  ;;  %676 = vrot.lane.b32.xlu2 %v3035_v51, %s2898_s15 }
  0x4c   :  { %1223 = vrot.lane.b32.xlu0 %v120_v58, %s2896_s1 }
  0x53   :  { %418 = vrot.lane.b32.xlu1 %v3035_v51, %s2899_s16  ;;  %815 = vrot.lane.b32.xlu2 %v3035_v51, %s2900_s17 }
  0x54   :  { %1219 = vrot.lane.b32.xlu0 %v118_v59, %s2896_s1 }
  0x5b   :  { %1225 = vrot.lane.b32.xlu1 %v121_v60, %s2896_s1 }
  0x63   :  { %560 = vrot.lane.b32.xlu1 %v3035_v51, %s2901_s18 }
  0x6d   :  { %v2796_v61 = vpop.permute.xlu2 %2795 }
  0x6e   :  { %v3080_v14 = vunpack.i.l.bf16 %v2796_v61  ;;  %v3087_v17 = vunpack.i.h.bf16 %v2796_v61 }
  0x75   :  { %v3054_v62 = vpop.permute.xlu2 %402 }
  0x7d   :  { %v134_v2 = vpop.permute.xlu2 %133 }
  0x7e   :  { %v3083_v15 = vsel %vm141_vm0, 0.0, %v134_v2 }
  0x7f   :  { %v178_v31 = vmul.f32 %v3087_v17, %v3083_v15 }
  0x85   :  { %v2791_v63 = vpop.permute.xlu1 %2790  ;;  %v2806_v40 = vpop.permute.xlu2 %2805 }
  0x86   :  { %v399_v0 = vpop.permute.xlu0 %398  ;;  %v2793_v5 = vunpack.i.h.bf16 %v2791_v63  ;;  %v2792_v6 = vunpack.i.l.bf16 %v2791_v63  ;;  %v3133_v42 = vunpack.i.h.bf16 %v2806_v40  ;;  %v3153_v53 = vunpack.i.l.bf16 %v2806_v40 }
  0x88   :  { %v3068_v11 = vsel %vm169_vm1, %v2792_v6, %v2793_v5  ;;  %v3096_v18 = vsel %vm169_vm1, %v3087_v17, %v2792_v6  ;;  %v3100_v20 = vsel %vm169_vm1, %v2793_v5, %v3080_v14  ;;  %v555_v47 = vmul.f32 %v3133_v42, %v3083_v15 }
  0x89   :  { %vm1116_vm1 = vcmask 777216  }
  0x8d   :  { %v401_v1 = vpop.permute.xlu1 %400  ;;  %v938_v54 = vpop.permute.xlu2 %937 }
  0x8e   :  { %v136_v3 = vpop.permute.xlu0 %135  ;;  %v3107_v26 = vsel %vm404_vm2, %v399_v0, %v401_v1  ;;  %v3131_v41 = vsel %vm404_vm2, %v401_v1, %v3054_v62 }
  0x8f   :  { %v3057_v4 = vsel %vm141_vm0, %v134_v2, %v136_v3 }
  0x90   :  { %682 = vrot.lane.b32.xlu2 %v3057_v4, %s2902_s19  ;;  %v179_v25 = vmul.f32 %v3096_v18, %v3057_v4 }
  0x95   :  { %v140_v7 = vpop.permute.xlu1 %139  ;;  %v3180_v2 = vpop.permute.xlu2 %935 }
  0x96   :  { %v138_v8 = vpop.permute.xlu0 %137  ;;  %v3078_v13 = vsel %vm141_vm0, %v140_v7, 0.0  ;;  %3899 = vst [vmem:[#allocation10_spill] sm:$0xff] %v3180_v2 }
  0x97   :  { %v3062_v9 = vsel %vm141_vm0, %v136_v3, %v138_v8  ;;  %v3065_v10 = vsel %vm141_vm0, %v138_v8, %v140_v7  ;;  %v182_v16 = vmul.f32 %v3080_v14, %v3078_v13  ;;  %v417_v33 = vmul.f32 %v3054_v62, %v3078_v13 }
  0x98   :  { %686 = vrot.lane.b32.xlu1 %v3065_v10, %s2902_s19  ;;  %684 = vrot.lane.b32.xlu0 %v3062_v9, %s2902_s19  ;;  %v180_v12 = vmul.f32 %v3068_v11, %v3062_v9  ;;  %v181_v24 = vmul.f32 %v3100_v20, %v3065_v10  ;;  %v415_v28 = vmul.f32 %v3107_v26, %v3062_v9 }
  0x99   :  { %v416_v46 = vmul.f32 %v3131_v41, %v3065_v10  ;;  %v559_v58 = vmul.f32 %v3153_v53, %v3078_v13 }
  0x9a   :  { %195 = vrot.lane.b32.xlu2 %v180_v12, %s2903_s20 }
  0x9d   :  { %v2801_v29 = vpop.permute.xlu1 %2800 }
  0x9e   :  { %v3109_v27 = vpop.permute.xlu0 %396  ;;  %v2803_v34 = vunpack.i.h.bf16 %v2801_v29  ;;  %v2802_v35 = vunpack.i.l.bf16 %v2801_v29 }
  0x9f   :  { %v3118_v30 = vsel %vm404_vm2, %v3109_v27, %v399_v0  ;;  %v413_v55 = vmul.f32 %v3109_v27, %v3083_v15  ;;  %vm1258_vm2 = vcmask 769024  }
  0xa0   :  { %688 = vrot.lane.b32.xlu0 %v3078_v13, %s2902_s19  ;;  %680 = vrot.lane.b32.xlu1 %v3083_v15, %s2902_s19  ;;  %v414_v32 = vmul.f32 %v3118_v30, %v3057_v4  ;;  %v3136_v45 = vsel %vm546_vm3, %v2802_v35, %v2803_v34  ;;  %v3168_v59 = vsel %vm546_vm3, %v2803_v34, %v3153_v53 }
  0xa1   :  { %v557_v50 = vmul.f32 %v3136_v45, %v3062_v9  ;;  %v3174_v61 = vsel %vm546_vm3, %v3133_v42, %v2802_v35  ;;  %v558_v0 = vmul.f32 %v3168_v59, %v3065_v10 }
  0xa2   :  { %199 = vrot.lane.b32.xlu2 %v182_v16, %s2903_s20  ;;  %v556_v5 = vmul.f32 %v3174_v61, %v3057_v4 }
  0xa5   :  { %v2816_v43 = vpop.permute.xlu1 %2815 }
  0xa6   :  { %v2811_v44 = vpop.permute.xlu0 %2810  ;;  %v3142_v48 = vunpack.i.l.bf16 %v2816_v43  ;;  %v3170_v60 = vunpack.i.h.bf16 %v2816_v43 }
  0xa7   :  { %v2813_v49 = vunpack.i.h.bf16 %v2811_v44  ;;  %v2812_v1 = vunpack.i.l.bf16 %v2811_v44 }
  0xa8   :  { %197 = vrot.lane.b32.xlu0 %v181_v24, %s2903_s20  ;;  %193 = vrot.lane.b32.xlu1 %v179_v25, %s2903_s20  ;;  %3898 = vst [vmem:[#allocation9_spill] sm:$0xff] %v3170_v60  ;;  %v810_v63 = vmul.f32 %v3170_v60, %v3083_v15  ;;  %v1222_v25 = vpop.permute.xlu2 %1221 }
  0xa9   :  { %v3151_v52 = vsel %vm801_vm4, %v2813_v49, %v3142_v48  ;;  %v3194_v8 = vsel %vm801_vm4, %v2812_v1, %v2813_v49  ;;  %v3198_v12 = vsel %vm801_vm4, %v3170_v60, %v2812_v1 }
  0xaa   :  { %429 = vrot.lane.b32.xlu2 %v415_v28, %s2904_s21  ;;  %3897 = vst [vmem:[#allocation8_spill] sm:$0xff] %v3151_v52  ;;  %v813_v57 = vmul.f32 %v3151_v52, %v3065_v10  ;;  %v812_v24 = vmul.f32 %v3194_v8, %v3062_v9  ;;  %v811_v28 = vmul.f32 %v3198_v12, %v3057_v4 }
  0xab   :  { %3902 = vst [vmem:[#allocation13_spill] sm:$0xff] %v3198_v12 }
  0xad   :  { %v3157_v56 = vpop.permute.xlu1 %184 }
  0xae   :  { %v940_v6 = vpop.permute.xlu0 %939 }
  0xaf   :  { %v3222_v43 = vsel %vm943_vm5, %v938_v54, %v940_v6 }
  0xb0   :  { %191 = vrot.lane.b32.xlu0 %v178_v31, %s2903_s20  ;;  %427 = vrot.lane.b32.xlu1 %v414_v32, %s2904_s21  ;;  %v952_v31 = vmul.f32 %v3180_v2, %v3083_v15  ;;  %v3217_v35 = vpop.permute.xlu2 %676  ;;  %3904 = vst [vmem:[#allocation15_spill] sm:$0xff] %v3222_v43 }
  0xb2   :  { %433 = vrot.lane.b32.xlu2 %v417_v33, %s2904_s21  ;;  %v814_v33 = vmul.f32 %v3142_v48, %v3078_v13 }
  0xb5   :  { %v3182_v3 = vpop.permute.xlu1 %941 }
  0xb6   :  { %3900 = vst [vmem:[#allocation11_spill] sm:$0xff] %v3182_v3  ;;  %v3191_v7 = vsel %vm943_vm5, %v940_v6, %v3182_v3  ;;  %v2821_v32 = vpop.permute.xlu0 %2820 }
  0xb7   :  { %3901 = vst [vmem:[#allocation12_spill] sm:$0xff] %v3191_v7  ;;  %v955_v16 = vmul.f32 %v3191_v7, %v3065_v10  ;;  %v2823_v40 = vunpack.i.h.bf16 %v2821_v32 }
  0xb8   :  { %431 = vrot.lane.b32.xlu0 %v416_v46, %s2904_s21  ;;  %567 = vrot.lane.b32.xlu1 %v555_v47, %s2898_s15  ;;  %v3230_v46 = vsel %vm943_vm5, %v3180_v2, %v938_v54  ;;  %v954_v47 = vmul.f32 %v3222_v43, %v3062_v9  ;;  %v3244_v54 = vpop.permute.xlu2 %815 }
  0xb9   :  { %3906 = vst [vmem:[#allocation17_spill] sm:$0xff] %v3230_v46 }
  0xba   :  { %571 = vrot.lane.b32.xlu2 %v557_v50, %s2898_s15 }
  0xbd   :  { %v2826_v29 = vpop.permute.xlu1 %2825 }
  0xbe   :  { %v3213_v34 = vunpack.i.l.bf16 %v2826_v29 }
  0xc0   :  { %425 = vrot.lane.b32.xlu0 %v413_v55, %s2904_s21  ;;  %828 = vrot.lane.b32.xlu1 %v813_v57, %s2905_s22  ;;  %3903 = vst [vmem:[#allocation14_spill] sm:$0xff] %v3213_v34  ;;  %v3226_v44 = vsel %vm1085_vm6, %v2823_v40, %v3213_v34  ;;  %v953_v55 = vmul.f32 %v3230_v46, %v3057_v4  ;;  %v3242_v57 = vunpack.i.h.bf16 %v2826_v29 }
  0xc1   :  { %3905 = vst [vmem:[#allocation16_spill] sm:$0xff] %v3226_v44  ;;  %v1097_v50 = vmul.f32 %v3226_v44, %v3065_v10 }
  0xc2   :  { %575 = vrot.lane.b32.xlu2 %v559_v58, %s2898_s15  ;;  %3907 = vst [vmem:[#allocation18_spill] sm:$0xff] %v3242_v57  ;;  %v956_v58 = vmul.f32 %v3182_v3, %v3078_v13 }
  0xc5   :  { %v3234_v49 = vpop.permute.xlu1 %418 }
  0xc8   :  { %822 = vrot.lane.b32.xlu1 %v810_v63, %s2905_s22  ;;  %573 = vrot.lane.b32.xlu0 %v558_v0, %s2898_s15  ;;  %v1094_v63 = vmul.f32 %v3242_v57, %v3083_v15  ;;  %v2822_v0 = vunpack.i.l.bf16 %v2821_v32 }
  0xca   :  { %569 = vrot.lane.b32.xlu2 %v556_v5, %s2898_s15  ;;  %v1224_v5 = vpop.permute.xlu0 %1223 }
  0xcd   :  { %v3251_v1 = vpop.permute.xlu1 %1225 }
  0xce   :  { %3908 = vst [vmem:[#allocation19_spill] sm:$0xff] %v3251_v1  ;;  %v3259_v6 = vsel %vm1227_vm7, %v1224_v5, %v3251_v1 }
  0xcf   :  { %3909 = vst [vmem:[#allocation20_spill] sm:$0xff] %v3259_v6  ;;  %v1239_v29 = vmul.f32 %v3259_v6, %v3065_v10 }
  0xd0   :  { %970 = vrot.lane.b32.xlu1 %v955_v16, %s2906_s23  ;;  %826 = vrot.lane.b32.xlu0 %v812_v24, %s2905_s22  ;;  %v3262_v16 = vsel %vm1085_vm6, %v2822_v0, %v2823_v40 }
  0xd1   :  { %3910 = vst [vmem:[#allocation21_spill] sm:$0xff] %v3262_v16 }
  0xd2   :  { %824 = vrot.lane.b32.xlu2 %v811_v28, %s2905_s22  ;;  %v3268_v28 = vsel %vm1085_vm6, %v3242_v57, %v2822_v0 }
  0xd3   :  { %3911 = vst [vmem:[#allocation22_spill] sm:$0xff] %v3268_v28  ;;  %v1095_v32 = vmul.f32 %v3268_v28, %v3057_v4 }
  0xd8   :  { %964 = vrot.lane.b32.xlu1 %v952_v31, %s2906_s23  ;;  %830 = vrot.lane.b32.xlu0 %v814_v33, %s2905_s22  ;;  %v1096_v31 = vmul.f32 %v3262_v16, %v3062_v9  ;;  %v3279_v33 = vpop.permute.xlu0 %1219 }
  0xd9   :  { %3912 = vst [vmem:[#allocation23_spill] sm:$0xff] %v3279_v33 }
  0xda   :  { %957 = vrot.lane.b32.xlu2 %v3035_v51, %s2907_s24 }
  0xe0   :  { %1112 = vrot.lane.b32.xlu1 %v1097_v50, %s2908_s25  ;;  %968 = vrot.lane.b32.xlu0 %v954_v47, %s2906_s23  ;;  %v1236_v47 = vmul.f32 %v3279_v33, %v3083_v15  ;;  %v1098_v50 = vmul.f32 %v3213_v34, %v3078_v13 }
  0xe2   :  { %966 = vrot.lane.b32.xlu2 %v953_v55, %s2906_s23  ;;  %v3290_v55 = vsel %vm1227_vm7, %v1222_v25, %v1224_v5  ;;  %v1240_v5 = vmul.f32 %v3251_v1, %v3078_v13  ;;  %v3323_v13 = vmul.f32 %v2978_v23, %v3007_v37  ;;  %v3327_v1 = vmul.f32 %v2972_v21, %v3013_v39 }
  0xe3   :  { %3913 = vst [vmem:[#allocation24_spill] sm:$0xff] %v3290_v55  ;;  %v1238_v0 = vmul.f32 %v3290_v55, %v3062_v9  ;;  %v3352_v37 = vmul.f32 %v2964_v19, %v3010_v38 }
  0xe4   :  { %3916 = vst [vmem:[#allocation27_spill] sm:$0xff] %v3323_v13  ;;  %v154_v23 = vmul.f32 %v3062_v9, %v3323_v13 }
  0xe5   :  { %3917 = vst [vmem:[#allocation28_spill] sm:$0xff] %v3327_v1 }
  0xe6   :  { %3918 = vst [vmem:[#allocation29_spill] sm:$0xff] %v3352_v37 }
  0xe8   :  { %1106 = vrot.lane.b32.xlu1 %v1094_v63, %s2908_s25  ;;  %972 = vrot.lane.b32.xlu0 %v956_v58, %s2906_s23  ;;  %v3294_v63 = vsel %vm1227_vm7, %v3279_v33, %v1222_v25 }
  0xe9   :  { %3914 = vst [vmem:[#allocation25_spill] sm:$0xff] %v3294_v63 }
  0xea   :  { %1099 = vrot.lane.b32.xlu2 %v3035_v51, %s2909_s26  ;;  %v3264_v24 = vpop.permute.xlu2 %682 }
  0xf0   :  { %1254 = vrot.lane.b32.xlu1 %v1239_v29, %s2910_s27  ;;  %1110 = vrot.lane.b32.xlu0 %v1096_v31, %s2908_s25  ;;  %v3299_v29 = vpop.permute.xlu1 %560  ;;  %v1237_v31 = vmul.f32 %v3294_v63, %v3057_v4 }
  0xf2   :  { %1108 = vrot.lane.b32.xlu2 %v1095_v32, %s2908_s25 }
  0xf4   :  { %v196_v40 = vpop.permute.xlu2 %195 }
  0xf8   :  { %1248 = vrot.lane.b32.xlu1 %v1236_v47, %s2910_s27  ;;  %1114 = vrot.lane.b32.xlu0 %v1098_v50, %s2908_s25 }
  0xfa   :  { %1241 = vrot.lane.b32.xlu2 %v3035_v51, %s2906_s23 }
  0xfc   :  { %v200_v58 = vpop.permute.xlu2 %199 }
 0x100   :  { %1252 = vrot.lane.b32.xlu0 %v1238_v0, %s2910_s27 }
 0x102   :  { %1250 = vrot.lane.b32.xlu2 %v1237_v31, %s2910_s27  ;;  %v3319_v31 = vmul.f32 %v2975_v22, %v3004_v36  ;;  %v155_v36 = vmul.f32 %v3065_v10, %v3327_v1 }
 0x104   :  { %v430_v32 = vpop.permute.xlu2 %429  ;;  %3915 = vst [vmem:[#allocation26_spill] sm:$0xff] %v3319_v31  ;;  %v153_v21 = vmul.f32 %v3057_v4, %v3319_v31 }
 0x108   :  { %1256 = vrot.lane.b32.xlu0 %v1240_v5, %s2910_s27 }
 0x10a   :  { %v3307_v25 = vpop.permute.xlu1 %686  ;;  %v3309_v47 = vpop.permute.xlu0 %684 }
 0x10c   :  { %v434_v50 = vpop.permute.xlu2 %433 }
 0x112   :  { %v3311_v33 = vpop.permute.xlu0 %688  ;;  %v3313_v0 = vpop.permute.xlu1 %680 }
 0x114   :  { %v3315_v6 = vpop.permute.xlu2 %571 }
 0x11a   :  { %v198_v5 = vpop.permute.xlu0 %197  ;;  %v194_v57 = vpop.permute.xlu1 %193 }
 0x11b   :  { %v203_v44 = vsel %vm201_vm8, %v194_v57, %v196_v40  ;;  %v204_v55 = vsel %vm201_vm8, %v196_v40, %v198_v5  ;;  %v205_v63 = vsel %vm201_vm8, %v198_v5, %v200_v58  ;;  %v152_v40 = vmul.f32 %v3083_v15, %v3352_v37 }
 0x11c   :  { %2621 = vmatpush.msk.msra.mxu1 %vm209_vm9, %v203_v44  ;;  %2623 = vmatpush.msk.msra.mxu2 %vm209_vm9, %v204_v55  ;;  %v576_v22 = vpop.permute.xlu2 %575 }
 0x11d   :  { %2625 = vmatpush.msk.msra.mxu3 %vm209_vm9, %v205_v63  ;;  %2622 = vmatmul.msk.f32.vlgmr.msra.gmra.mxu1 %vm206_vm10, %v3157_v56 }
 0x11e   :  { %2624 = vmatmul.msk.f32.vlgmr.msra.gmra.mxu2 %vm206_vm10, %v3157_v56  ;;  %2626 = vmatmul.msk.f32.vlgmr.msra.gmra.mxu3 %vm206_vm10, %v3157_v56 }
 0x11f   :  { %2629 = vmatpush.msk.msrb.mxu1 %vm209_vm9, %v153_v21  ;;  %2631 = vmatpush.msk.msrb.mxu2 %vm209_vm9, %v154_v23 }
 0x120   :  { %2633 = vmatpush.msk.msrb.mxu3 %vm209_vm9, %v155_v36 }
 0x122   :  { %v192_v39 = vpop.permute.xlu0 %191  ;;  %v428_v4 = vpop.permute.xlu1 %427 }
 0x123   :  { %v437_v9 = vsel %vm435_vm11, %v428_v4, %v430_v32  ;;  %v202_v44 = vsel %vm201_vm8, %v192_v39, %v194_v57  ;;  %v692_v57 = vsel %vm690_vm13, %v3264_v24, %v3309_v47 }
 0x124   :  { %2619 = vmatpush.msk.msra.mxu0 %vm209_vm9, %v202_v44  ;;  %2637 = vmatpush.msk.msra.mxu1 %vm209_vm9, %v437_v9  ;;  %v570_v10 = vpop.permute.xlu2 %569 }
 0x125   :  { %v579_v55 = vsel %vm577_vm12, %v570_v10, %v3315_v6  ;;  %2620 = vmatmul.msk.f32.vlgmr.msra.gmra.mxu0 %vm206_vm10, %v3157_v56  ;;  %2630 = vmatmul.msk.f32.vlgmr.msrb.gmra.mxu1 %vm206_vm10, %v3035_v51 }
 0x126   :  { %2627 = vmatpush.msk.msrb.mxu0 %vm209_vm9, %v152_v40  ;;  %2632 = vmatmul.msk.f32.vlgmr.msrb.gmra.mxu2 %vm206_vm10, %v3035_v51 }
 0x127   :  { %2634 = vmatmul.msk.f32.vlgmr.msrb.gmra.mxu3 %vm206_vm10, %v3035_v51  ;;  %2645 = vmatpush.msk.msrb.mxu1 %vm209_vm9, %v579_v55 }
 0x12a   :  { %v432_v19 = vpop.permute.xlu0 %431  ;;  %v568_v38 = vpop.permute.xlu1 %567 }
 0x12b   :  { %v438_v15 = vsel %vm435_vm11, %v430_v32, %v432_v19  ;;  %v439_v56 = vsel %vm435_vm11, %v432_v19, %v434_v50  ;;  %v578_v5 = vsel %vm577_vm12, %v568_v38, %v570_v10 }
 0x12c   :  { %2639 = vmatpush.msk.msra.mxu2 %vm209_vm9, %v438_v15  ;;  %2641 = vmatpush.msk.msra.mxu3 %vm209_vm9, %v439_v56  ;;  %v825_v58 = vpop.permute.xlu2 %824 }
 0x12d   :  { %2628 = vmatmul.msk.f32.vlgmr.msrb.gmra.mxu0 %vm206_vm10, %v3035_v51  ;;  %2638 = vmatmul.msk.f32.vlgmr.msra.gmra.mxu1 %vm206_vm10, %v3234_v49  ;;  %v691_v51 = vsel %vm690_vm13, %v3313_v0, %v3264_v24  ;;  %v693_v24 = vsel %vm690_vm13, %v3309_v47, %v3307_v25 }
 0x12e   :  { %2640 = vmatmul.msk.f32.vlgmr.msra.gmra.mxu2 %vm206_vm10, %v3234_v49  ;;  %2653 = vmatpush.msk.msra.mxu1 %vm209_vm9, %v692_v57 }
 0x12f   :  { %2642 = vmatmul.msk.f32.vlgmr.msra.gmra.mxu3 %vm206_vm10, %v3234_v49 }
 0x132   :  { %v426_v63 = vpop.permute.xlu0 %425  ;;  %v829_v32 = vpop.permute.xlu1 %828 }
 0x133   :  { %v436_v50 = vsel %vm435_vm11, %v426_v63, %v428_v4 }
 0x134   :  { %2635 = vmatpush.msk.msra.mxu0 %vm209_vm9, %v436_v50  ;;  %v958_v21 = vpop.permute.xlu2 %957 }
 0x135   :  { %2636 = vmatmul.msk.f32.vlgmr.msra.gmra.mxu0 %vm206_vm10, %v3234_v49  ;;  %2646 = vmatmul.msk.f32.vlgmr.msrb.gmra.mxu1 %vm206_vm10, %v3299_v29 }
 0x136   :  { %2643 = vmatpush.msk.msrb.mxu0 %vm209_vm9, %v578_v5 }
 0x138   :  { %2651 = vmatpush.msk.msra.mxu0 %vm209_vm9, %v691_v51 }
 0x13a   :  { %v823_v23 = vpop.permute.xlu1 %822  ;;  %v574_v36 = vpop.permute.xlu0 %573 }
 0x13b   :  { %v580_v39 = vsel %vm577_vm12, %v3315_v6, %v574_v36  ;;  %v581_v49 = vsel %vm577_vm12, %v574_v36, %v576_v22  ;;  %v833_v4 = vsel %vm832_vm14, %v823_v23, %v825_v58  ;;  %v694_v6 = vsel %vm690_vm13, %v3307_v25, %v3311_v33 }
 0x13c   :  { %2647 = vmatpush.msk.msrb.mxu2 %vm209_vm9, %v580_v39  ;;  %2649 = vmatpush.msk.msrb.mxu3 %vm209_vm9, %v581_v49  ;;  %v967_v0 = vpop.permute.xlu2 %966 }
 0x13d   :  { %2644 = vmatmul.msk.f32.vlgmr.msrb.gmra.mxu0 %vm206_vm10, %v3299_v29  ;;  %2648 = vmatmul.msk.f32.vlgmr.msrb.gmra.mxu2 %vm206_vm10, %v3299_v29 }
 0x13e   :  { %2650 = vmatmul.msk.f32.vlgmr.msrb.gmra.mxu3 %vm206_vm10, %v3299_v29  ;;  %2654 = vmatmul.msk.f32.vlgmr.msra.gmra.mxu1 %vm206_vm10, %v3217_v35 }
 0x13f   :  { %2655 = vmatpush.msk.msra.mxu2 %vm209_vm9, %v693_v24  ;;  %2657 = vmatpush.msk.msra.mxu3 %vm209_vm9, %v694_v6 }
 0x140   :  { %2659 = vmatpush.msk.msrb.mxu0 %vm209_vm9, %v833_v4 }
 0x142   :  { %v971_v22 = vpop.permute.xlu1 %970  ;;  %v827_v9 = vpop.permute.xlu0 %826 }
 0x143   :  { %v834_v47 = vsel %vm832_vm14, %v825_v58, %v827_v9  ;;  %v835_v44 = vsel %vm832_vm14, %v827_v9, %v829_v32 }
 0x144   :  { %2661 = vmatpush.msk.msrb.mxu1 %vm209_vm9, %v834_v47  ;;  %2663 = vmatpush.msk.msrb.mxu2 %vm209_vm9, %v835_v44  ;;  %v1100_v25 = vpop.permute.xlu2 %1099 }
 0x145   :  { %2652 = vmatmul.msk.f32.vlgmr.msra.gmra.mxu0 %vm206_vm10, %v3217_v35  ;;  %2656 = vmatmul.msk.f32.vlgmr.msra.gmra.mxu2 %vm206_vm10, %v3217_v35 }
 0x146   :  { %2658 = vmatmul.msk.f32.vlgmr.msra.gmra.mxu3 %vm206_vm10, %v3217_v35  ;;  %2662 = vmatmul.msk.f32.vlgmr.msrb.gmra.mxu1 %vm206_vm10, %v3244_v54 }
 0x14a   :  { %v965_v33 = vpop.permute.xlu1 %964  ;;  %v831_v29 = vpop.permute.xlu0 %830 }
 0x14b   :  { %v975_v10 = vsel %vm974_vm15, %v965_v33, %v967_v0  ;;  %v836_v40 = vsel %vm832_vm14, %v829_v32, %v831_v29 }
 0x14c   :  { %2667 = vmatpush.msk.msra.mxu0 %vm209_vm9, %v975_v10  ;;  %2665 = vmatpush.msk.msrb.mxu3 %vm209_vm9, %v836_v40  ;;  %v1109_v15 = vpop.permute.xlu2 %1108 }
 0x14d   :  { %2660 = vmatmul.msk.f32.vlgmr.msrb.gmra.mxu0 %vm206_vm10, %v3244_v54  ;;  %2664 = vmatmul.msk.f32.vlgmr.msrb.gmra.mxu2 %vm206_vm10, %v3244_v54 }
 0x14e   :  { %2666 = vmatmul.msk.f32.vlgmr.msrb.gmra.mxu3 %vm206_vm10, %v3244_v54 }
 0x152   :  { %v1113_v35 = vpop.permute.xlu1 %1112  ;;  %v969_v55 = vpop.permute.xlu0 %968 }
 0x153   :  { %v976_v19 = vsel %vm974_vm15, %v967_v0, %v969_v55  ;;  %v977_v38 = vsel %vm974_vm15, %v969_v55, %v971_v22 }
 0x154   :  { %2669 = vmatpush.msk.msra.mxu1 %vm209_vm9, %v976_v19  ;;  %2671 = vmatpush.msk.msra.mxu2 %vm209_vm9, %v977_v38  ;;  %v1242_v63 = vpop.permute.xlu2 %1241 }
 0x155   :  { %2668 = vmatmul.msk.f32.vlgmr.msra.gmra.mxu0 %vm206_vm10, %v958_v21  ;;  %2670 = vmatmul.msk.f32.vlgmr.msra.gmra.mxu1 %vm206_vm10, %v958_v21 }
 0x156   :  { %2672 = vmatmul.msk.f32.vlgmr.msra.gmra.mxu2 %vm206_vm10, %v958_v21 }
 0x15a   :  { %v1107_v56 = vpop.permute.xlu1 %1106  ;;  %v973_v54 = vpop.permute.xlu0 %972 }
 0x15b   :  { %v1117_v57 = vsel %vm1116_vm1, %v1107_v56, %v1109_v15  ;;  %v978_v58 = vsel %vm974_vm15, %v971_v22, %v973_v54 }
 0x15c   :  { %2675 = vmatpush.msk.msrb.mxu0 %vm209_vm9, %v1117_v57  ;;  %2673 = vmatpush.msk.msra.mxu3 %vm209_vm9, %v978_v58  ;;  %v1251_v23 = vpop.permute.xlu2 %1250 }
 0x15d   :  { %2674 = vmatmul.msk.f32.vlgmr.msra.gmra.mxu3 %vm206_vm10, %v958_v21  ;;  %2676 = vmatmul.msk.f32.vlgmr.msrb.gmra.mxu0 %vm206_vm10, %v1100_v25 }
 0x162   :  { %v1255_v32 = vpop.permute.xlu1 %1254  ;;  %v1111_v50 = vpop.permute.xlu0 %1110 }
 0x163   :  { %v1118_v5 = vsel %vm1116_vm1, %v1109_v15, %v1111_v50  ;;  %v1119_v51 = vsel %vm1116_vm1, %v1111_v50, %v1113_v35 }
 0x164   :  { %2677 = vmatpush.msk.msrb.mxu1 %vm209_vm9, %v1118_v5  ;;  %2679 = vmatpush.msk.msrb.mxu2 %vm209_vm9, %v1119_v51 }
 0x165   :  { %2678 = vmatmul.msk.f32.vlgmr.msrb.gmra.mxu1 %vm206_vm10, %v1100_v25  ;;  %2680 = vmatmul.msk.f32.vlgmr.msrb.gmra.mxu2 %vm206_vm10, %v1100_v25 }
 0x16a   :  { %v1249_v21 = vpop.permute.xlu1 %1248  ;;  %v1115_v36 = vpop.permute.xlu0 %1114 }
 0x16b   :  { %v1259_v39 = vsel %vm1258_vm2, %v1249_v21, %v1251_v23  ;;  %v1120_v49 = vsel %vm1116_vm1, %v1113_v35, %v1115_v36 }
 0x16c   :  { %2681 = vmatpush.msk.msrb.mxu3 %vm209_vm9, %v1120_v49  ;;  %2683 = vmatpush.msk.msra.mxu0 %vm209_vm9, %v1259_v39 }
 0x16d   :  { %2682 = vmatmul.msk.f32.vlgmr.msrb.gmra.mxu3 %vm206_vm10, %v1100_v25  ;;  %2684 = vmatmul.msk.f32.vlgmr.msra.gmra.mxu0 %vm206_vm10, %v1242_v63 }
 0x172   :  { %v1253_v4 = vpop.permute.xlu0 %1252 }
 0x173   :  { %v1260_v24 = vsel %vm1258_vm2, %v1251_v23, %v1253_v4  ;;  %v1261_v6 = vsel %vm1258_vm2, %v1253_v4, %v1255_v32 }
 0x174   :  { %2685 = vmatpush.msk.msra.mxu1 %vm209_vm9, %v1260_v24  ;;  %2687 = vmatpush.msk.msra.mxu2 %vm209_vm9, %v1261_v6 }
 0x175   :  { %2686 = vmatmul.msk.f32.vlgmr.msra.gmra.mxu1 %vm206_vm10, %v1242_v63  ;;  %2688 = vmatmul.msk.f32.vlgmr.msra.gmra.mxu2 %vm206_vm10, %v1242_v63 }
 0x17a   :  { %v1257_v0 = vpop.permute.xlu0 %1256 }
 0x17b   :  { %v1262_v22 = vsel %vm1258_vm2, %v1255_v32, %v1257_v0 }
 0x17c   :  { %2689 = vmatpush.msk.msra.mxu3 %vm209_vm9, %v1262_v22 }
 0x17d   :  { %2690 = vmatmul.msk.f32.vlgmr.msra.gmra.mxu3 %vm206_vm10, %v1242_v63 }
 0x19a   :  { %v255_v47 = vpop.f32.mrf.mxu1 }
 0x1a1   :  { %v275_v44 = vpop.f32.mrf.mxu2  ;;  %v295_v25 = vpop.f32.mrf.mxu3 }
 0x1a2   :  { %v235_v9 = vpop.f32.mrf.mxu0  ;;  %v349_v29 = vpop.f32.mrf.mxu1 }
 0x1a3   :  { %v350_v4 = vadd.f32 %v349_v29, %v255_v47 }
 0x1a9   :  { %v369_v10 = vpop.f32.mrf.mxu2 }
 0x1aa   :  { %v329_v33 = vpop.f32.mrf.mxu0  ;;  %v487_v35 = vpop.f32.mrf.mxu1  ;;  %v370_v24 = vadd.f32 %v369_v10, %v275_v44 }
 0x1ab   :  { %v389_v55 = vpop.f32.mrf.mxu3  ;;  %v330_v6 = vadd.f32 %v329_v33, %v235_v9  ;;  %v531_v0 = vadd.f32 %v487_v35, %v350_v4 }
 0x1ac   :  { %v390_v12 = vadd.f32 %v389_v55, %v295_v25 }
 0x1b1   :  { %v507_v19 = vpop.f32.mrf.mxu2 }
 0x1b2   :  { %v467_v40 = vpop.f32.mrf.mxu0  ;;  %v629_v15 = vpop.f32.mrf.mxu1  ;;  %v532_v37 = vadd.f32 %v507_v19, %v370_v24 }
 0x1b3   :  { %v527_v54 = vpop.f32.mrf.mxu3  ;;  %v530_v13 = vadd.f32 %v467_v40, %v330_v6  ;;  %v673_v31 = vadd.f32 %v629_v15, %v531_v0 }
 0x1b4   :  { %v533_v9 = vadd.f32 %v527_v54, %v390_v12 }
 0x1ba   :  { %v609_v38 = vpop.f32.mrf.mxu0 }
 0x1bb   :  { %v742_v58 = vpop.f32.mrf.mxu1  ;;  %v672_v2 = vadd.f32 %v609_v38, %v530_v13 }
 0x1bc   :  { %v786_v34 = vadd.f32 %v742_v58, %v673_v31 }
 0x1c0   :  { %v649_v56 = vpop.f32.mrf.mxu2 }
 0x1c1   :  { %v669_v32 = vpop.f32.mrf.mxu3  ;;  %v674_v28 = vadd.f32 %v649_v56, %v532_v37 }
 0x1c2   :  { %v722_v57 = vpop.f32.mrf.mxu0  ;;  %v675_v35 = vadd.f32 %v669_v32, %v533_v9 }
 0x1c3   :  { %v884_v5 = vpop.f32.mrf.mxu1  ;;  %v785_v46 = vadd.f32 %v722_v57, %v672_v2 }
 0x1c4   :  { %v928_v60 = vadd.f32 %v884_v5, %v786_v34 }
 0x1c8   :  { %v762_v50 = vpop.f32.mrf.mxu2 }
 0x1c9   :  { %v782_v51 = vpop.f32.mrf.mxu3  ;;  %v787_v3 = vadd.f32 %v762_v50, %v674_v28 }
 0x1ca   :  { %v864_v63 = vpop.f32.mrf.mxu0  ;;  %v788_v2 = vadd.f32 %v782_v51, %v675_v35  ;;  %v1383_v35 = vld [vmem:[%s3870_s3] sm:$0xf] }
 0x1cb   :  { %v927_v52 = vadd.f32 %v864_v63, %v785_v46 }
 0x1d0   :  { %v904_v23 = vpop.f32.mrf.mxu2 }
 0x1d1   :  { %v924_v39 = vpop.f32.mrf.mxu3  ;;  %v929_v43 = vadd.f32 %v904_v23, %v787_v3 }
 0x1d2   :  { %v1006_v21 = vpop.f32.mrf.mxu0  ;;  %v1026_v36 = vpop.f32.mrf.mxu1  ;;  %v930_v3 = vadd.f32 %v924_v39, %v788_v2  ;;  %v1409_v39 = vld [vmem:[%s3871_s4] sm:$0xf] }
 0x1d3   :  { %v1070_v47 = vadd.f32 %v1026_v36, %v928_v60  ;;  %v1069_v33 = vadd.f32 %v1006_v21, %v927_v52  ;;  %v2911_v36 = vmov 0  }
 0x1d4   :  { %2829 = vset.pattern.permute.xlu2 %v2911_v36  ;;  %2830 = vset.pattern.permute.xlu0 %v2911_v36 }
 0x1d5   :  { %1412 = vperm.xlu2 %2829, %v1409_v39  }
 0x1d9   :  { %v1046_v49 = vpop.f32.mrf.mxu2 }
 0x1da   :  { %v1148_v1 = vpop.f32.mrf.mxu0  ;;  %v1071_v29 = vadd.f32 %v1046_v49, %v929_v43  ;;  %v3508_v49 = vld [vmem:[%s3869_s2] sm:$0xf] }
 0x1db   :  { %v1211_v19 = vadd.f32 %v1148_v1, %v1069_v33 }
 0x1dd   :  { %1456 = vrot.lane.b32.xlu2 %v3508_v49, %s2895_s13  ;;  %s2593_s13 = sshll.u32 %s3874_s7, 4  ;;  %s2594_s13 = int_to_ptr.hbm [resolvable:$true] %s2593_s13 }
 0x1e0   :  { %v1066_v7 = vpop.f32.mrf.mxu3 }
 0x1e1   :  { %v1072_v52 = vadd.f32 %v1066_v7, %v930_v3 }
 0x1e2   :  { %v1168_v22 = vpop.f32.mrf.mxu1 }
 0x1e3   :  { %v1212_v10 = vadd.f32 %v1168_v22, %v1070_v47 }
 0x1e8   :  { %v1188_v16 = vpop.f32.mrf.mxu2 }
 0x1e9   :  { %v1213_v13 = vadd.f32 %v1188_v16, %v1071_v29 }
 0x1ea   :  { %v1290_v40 = vpop.f32.mrf.mxu0 }
 0x1eb   :  { %v3481_v34 = vadd.f32 %v1290_v40, %v1211_v19 }
 0x1ed   :  { %v1367_v12 = vmul.f32 %v3481_v34, %v3481_v34  ;;  %v1357_v1 = vsel %vm209_vm9, %v3481_v34, 0.0 }
 0x1ef   :  { %v1371_v54 = vsel %vm209_vm9, %v1367_v12, 0.0 }
 0x1f0   :  { %v1208_v37 = vpop.f32.mrf.mxu3 }
 0x1f1   :  { %v1214_v16 = vadd.f32 %v1208_v37, %v1072_v52 }
 0x1f2   :  { %v1310_v44 = vpop.f32.mrf.mxu1 }
 0x1f3   :  { %v3479_v31 = vadd.f32 %v1310_v44, %v1212_v10 }
 0x1f5   :  { %v1368_v60 = vmul.f32 %v3479_v31, %v3479_v31  ;;  %v1358_v43 = vsel %vm209_vm9, %v3479_v31, 0.0 }
 0x1f6   :  { %v1359_v7 = vadd.f32 %v1358_v43, %v1357_v1 }
 0x1f7   :  { %v1372_v55 = vsel %vm209_vm9, %v1368_v60, 0.0 }
 0x1f8   :  { %v1330_v38 = vpop.f32.mrf.mxu2  ;;  %v1373_v32 = vadd.f32 %v1372_v55, %v1371_v54 }
 0x1f9   :  { %v3483_v28 = vadd.f32 %v1330_v38, %v1213_v13 }
 0x1fb   :  { %v1369_v46 = vmul.f32 %v3483_v28, %v3483_v28  ;;  %v1360_v25 = vsel %vm209_vm9, %v3483_v28, 0.0 }
 0x1fc   :  { %v1361_v58 = vadd.f32 %v1360_v25, %v1359_v7 }
 0x1fd   :  { %v1374_v57 = vsel %vm209_vm9, %v1369_v46, 0.0 }
 0x1fe   :  { %v1375_v51 = vadd.f32 %v1374_v57, %v1373_v32 }
 0x200   :  { %v1350_v15 = vpop.f32.mrf.mxu3 }
 0x201   :  { %v1356_v56 = vadd.f32 %v1350_v15, %v1214_v16 }
 0x203   :  { %v1362_v50 = vsel %vm209_vm9, %v1356_v56, 0.0  ;;  %v1370_v63 = vmul.f32 %v1356_v56, %v1356_v56 }
 0x204   :  { %v1363_v5 = vadd.f32 %v1362_v50, %v1361_v58 }
 0x205   :  { %v1376_v23 = vsel %vm209_vm9, %v1370_v63, 0.0 }
 0x206   :  { %1364 = vadd.xlane.f32.xlu0 %v1363_v5  ;;  %v1377_v21 = vadd.f32 %v1376_v23, %v1375_v51 }
 0x208   :  { %1378 = vadd.xlane.f32.xlu1 %v1377_v21 }
 0x22f   :  { %v1413_v38 = vpop.permute.xlu2 %1412 }
 0x237   :  { %v3519_v2 = vpop.permute.xlu2 %1456 }
 0x279   :  { %v1365_v4 = vpop.xlane.xlu0 %1364 }
 0x27a   :  { %v1366_v24 = vmul.f32 0.001953125, %v1365_v4 }
 0x27b   :  { %v1379_v6 = vpop.xlane.xlu1 %1378 }
 0x27c   :  { %v1380_v0 = vmul.f32 0.001953125, %v1379_v6  ;;  %v1381_v22 = vmul.f32 %v1366_v24, %v1366_v24  ;;  %v1397_v3 = vsub.f32 %v3479_v31, %v1366_v24  ;;  %v1398_v12 = vsub.f32 %v3483_v28, %v1366_v24 }
 0x27d   :  { %v1399_v25 = vsub.f32 %v1356_v56, %v1366_v24  ;;  %v1396_v54 = vsub.f32 %v3481_v34, %v1366_v24 }
 0x27e   :  { %v1382_v47 = vsub.f32 %v1380_v0, %v1381_v22 }
 0x280   :  { %v1384_v44 = vadd.f32 1e-05, %v1382_v47 }
 0x282   :  { %2831 = vrsqrt.f32 %v1384_v44  ;;  %vm1391_vm4 = vweird.f32 %v1384_v44 }
 0x288   :  { %v2832_v9 = vpop.eup %2831 }
 0x289   :  { %v1386_v33 = vmul.f32 %v2832_v9, %v1384_v44  ;;  %vm1392_vm3 = vweird.f32 %v2832_v9  ;;  %v3921_v44 = vld [vmem:[#allocation13_spill] sm:$0xff] }
 0x28a   :  { %vm1393_vm5 = vmor %vm1391_vm4, %vm1392_vm3 }
 0x28b   :  { %v1387_v29 = vmul.f32 %v2832_v9, %v1386_v33 }
 0x28d   :  { %v1388_v10 = vmul.f32 0.5, %v1387_v29  ;;  %v3923_v29 = vld [vmem:[#allocation9_spill] sm:$0xff] }
 0x28f   :  { %v1389_v40 = vsub.f32 1.5, %v1388_v10 }
 0x291   :  { %v1390_v19 = vmul.f32 %v2832_v9, %v1389_v40  ;;  %v3924_v40 = vld [vmem:[#allocation17_spill] sm:$0xff] }
 0x293   :  { %v1394_v13 = vsel %vm1393_vm5, %v2832_v9, %v1390_v19  ;;  %v3925_v19 = vld [vmem:[#allocation21_spill] sm:$0xff] }
 0x294   :  { %v1395_v37 = vmul.f32 %v1394_v13, %v1383_v35 }
 0x296   :  { %1402 = vperm.xlu2 %2829, %v1395_v37   ;;  %v3926_v37 = vld [vmem:[#allocation12_spill] sm:$0xff] }
 0x29e   :  { %1666 = vrot.lane.b32.xlu2 %v3508_v49, %s2899_s16 }
 0x2a6   :  { %1786 = vrot.lane.b32.xlu2 %v3508_v49, %s2901_s18 }
 0x2f0   :  { %v1403_v60 = vpop.permute.xlu2 %1402 }
 0x2f1   :  { %v1406_v52 = vmul.f32 %v1403_v60, %v1397_v3  ;;  %v1407_v46 = vmul.f32 %v1403_v60, %v1398_v12  ;;  %v1408_v55 = vmul.f32 %v1403_v60, %v1399_v25  ;;  %v1405_v57 = vmul.f32 %v1403_v60, %v1396_v54  ;;  %v3927_v3 = vld [vmem:[#allocation22_spill] sm:$0xff]  ;;  %v3932_v54 = vld [vmem:[#allocation16_spill] sm:$0xff] }
 0x2f2   :  { %v3928_v12 = vld [vmem:[#allocation14_spill] sm:$0xff] }
 0x2f3   :  { %v1416_v43 = vadd.f32 %v1413_v38, %v1406_v52  ;;  %v1417_v16 = vadd.f32 %v1413_v38, %v1407_v46  ;;  %v1418_v7 = vadd.f32 %v1413_v38, %v1408_v55  ;;  %v1415_v58 = vadd.f32 %v1413_v38, %v1405_v57  ;;  %v3929_v46 = vld [vmem:[#allocation10_spill] sm:$0xff] }
 0x2f5   :  { %v1420_v1 = vmax.f32 %v1416_v43, 0.0  ;;  %v1421_v15 = vmax.f32 %v1417_v16, 0.0  ;;  %v1422_v31 = vmax.f32 %v1418_v7, 0.0  ;;  %v1419_v28 = vmax.f32 %v1415_v58, 0.0  ;;  %v3930_v16 = vld [vmem:[#allocation25_spill] sm:$0xff]  ;;  %v3933_v58 = vld [vmem:[#allocation19_spill] sm:$0xff] }
 0x2f7   :  { %1429 = vrot.lane.b32.xlu2 %v1420_v1, %s2891_s30 }
 0x2f8   :  { %v3534_v56 = vpop.permute.xlu2 %1666 }
 0x2ff   :  { %1431 = vrot.lane.b32.xlu2 %v1421_v15, %s2891_s30  ;;  %v3931_v15 = vld [vmem:[#allocation24_spill] sm:$0xff] }
 0x300   :  { %v3536_v34 = vpop.permute.xlu2 %1786 }
 0x307   :  { %1433 = vrot.lane.b32.xlu2 %v1422_v31, %s2891_s30 }
 0x30f   :  { %1427 = vrot.lane.b32.xlu2 %v1419_v28, %s2891_s30 }
 0x317   :  { %1901 = vrot.lane.b32.xlu2 %v3508_v49, %s2898_s15 }
 0x31f   :  { %2018 = vrot.lane.b32.xlu2 %v3508_v49, %s2900_s17 }
 0x327   :  { %2138 = vrot.lane.b32.xlu2 %v3508_v49, %s2907_s24 }
 0x351   :  { %v1430_v32 = vpop.permute.xlu2 %1429 }
 0x359   :  { %v1432_v50 = vpop.permute.xlu2 %1431 }
 0x35a   :  { %v3539_v63 = vsel %vm141_vm0, %v1430_v32, %v1432_v50 }
 0x35b   :  { %1909 = vrot.lane.b32.xlu1 %v3539_v63, %s2902_s19  ;;  %v1663_v24 = vmul.f32 %v3539_v63, %v3107_v26  ;;  %v2255_v13 = vmul.f32 %v3539_v63, %v3925_v19  ;;  %v2375_v7 = vmul.f32 %v3539_v63, %v3931_v15 }
 0x361   :  { %v1434_v5 = vpop.permute.xlu2 %1433 }
 0x362   :  { %v3544_v51 = vsel %vm141_vm0, %v1432_v50, %v1434_v5  ;;  %v3547_v23 = vsel %vm141_vm0, %v1434_v5, 0.0 }
 0x363   :  { %1913 = vrot.lane.b32.xlu1 %v3547_v23, %s2902_s19  ;;  %1911 = vrot.lane.b32.xlu0 %v3544_v51, %s2902_s19  ;;  %v1453_v36 = vmul.f32 %v3544_v51, %v3100_v20  ;;  %v1452_v20 = vmul.f32 %v3539_v63, %v3068_v11  ;;  %v1454_v6 = vmul.f32 %v3080_v14, %v3547_v23 }
 0x364   :  { %v1665_v0 = vmul.f32 %v3547_v23, %v3054_v62  ;;  %v1783_v11 = vmul.f32 %v3539_v63, %v3136_v45  ;;  %v1664_v14 = vmul.f32 %v3544_v51, %v3131_v41  ;;  %v1785_v62 = vmul.f32 %v3153_v53, %v3547_v23 }
 0x365   :  { %v2015_v41 = vmul.f32 %v3539_v63, %v3194_v8  ;;  %v1784_v45 = vmul.f32 %v3544_v51, %v3168_v59  ;;  %v3919_v59 = vld [vmem:[#allocation15_spill] sm:$0xff]  ;;  %v3920_v8 = vld [vmem:[#allocation8_spill] sm:$0xff]  ;;  %v2136_v38 = vmul.f32 %v3544_v51, %v3926_v37  ;;  %v2257_v43 = vmul.f32 %v3928_v12, %v3547_v23 }
 0x366   :  { %v2016_v47 = vmul.f32 %v3544_v51, %v3920_v8  ;;  %v2256_v57 = vmul.f32 %v3544_v51, %v3932_v54  ;;  %v2377_v28 = vmul.f32 %v3547_v23, %v3933_v58 }
 0x369   :  { %v1428_v21 = vpop.permute.xlu2 %1427 }
 0x36a   :  { %v3556_v39 = vsel %vm141_vm0, %v1428_v21, %v1430_v32  ;;  %v3559_v4 = vsel %vm141_vm0, 0.0, %v1428_v21  ;;  %v3934_v32 = vld [vmem:[#allocation18_spill] sm:$0xff] }
 0x36b   :  { %1469 = vrot.lane.b32.xlu1 %v1453_v36, %s2903_s20  ;;  %1905 = vrot.lane.b32.xlu0 %v3559_v4, %s2902_s19  ;;  %v1450_v22 = vmul.f32 %v3087_v17, %v3559_v4  ;;  %v1451_v26 = vmul.f32 %v3556_v39, %v3096_v18  ;;  %v1661_v17 = vmul.f32 %v3559_v4, %v3109_v27  ;;  %v3935_v36 = vld [vmem:[#allocation20_spill] sm:$0xff] }
 0x36c   :  { %1907 = vrot.lane.b32.xlu2 %v3556_v39, %s2902_s19  ;;  %v1662_v18 = vmul.f32 %v3556_v39, %v3118_v30  ;;  %v1782_v53 = vmul.f32 %v3556_v39, %v3174_v61  ;;  %v2017_v27 = vmul.f32 %v3142_v48, %v3547_v23  ;;  %v1781_v30 = vmul.f32 %v3133_v42, %v3559_v4  ;;  %v3922_v48 = vld [vmem:[#allocation11_spill] sm:$0xff] }
 0x36d   :  { %v2135_v61 = vmul.f32 %v3539_v63, %v3919_v59  ;;  %v2014_v9 = vmul.f32 %v3556_v39, %v3921_v44  ;;  %v2137_v33 = vmul.f32 %v3547_v23, %v3922_v48  ;;  %v2013_v10 = vmul.f32 %v3923_v29, %v3559_v4  ;;  %v3938_v59 = vld [vmem:[#allocation26_spill] sm:$0xff] }
 0x36e   :  { %v2134_v35 = vmul.f32 %v3556_v39, %v3924_v40  ;;  %v2254_v60 = vmul.f32 %v3556_v39, %v3927_v3  ;;  %v2133_v1 = vmul.f32 %v3559_v4, %v3929_v46  ;;  %v2374_v25 = vmul.f32 %v3556_v39, %v3930_v16 }
 0x36f   :  { %v2253_v50 = vmul.f32 %v3934_v32, %v3559_v4 }
 0x371   :  { %v3627_v42 = vpop.permute.xlu2 %1901 }
 0x373   :  { %1677 = vrot.lane.b32.xlu1 %v1663_v24, %s2904_s21  ;;  %1467 = vrot.lane.b32.xlu0 %v1452_v20, %s2903_s20  ;;  %v2376_v24 = vmul.f32 %v3544_v51, %v3935_v36 }
 0x374   :  { %1471 = vrot.lane.b32.xlu2 %v1454_v6, %s2903_s20 }
 0x379   :  { %v3644_v52 = vpop.permute.xlu2 %2018 }
 0x37b   :  { %1681 = vrot.lane.b32.xlu1 %v1665_v0, %s2904_s21  ;;  %1463 = vrot.lane.b32.xlu0 %v1450_v22, %s2903_s20  ;;  %v3936_v0 = vld [vmem:[#allocation23_spill] sm:$0xff] }
 0x37c   :  { %1465 = vrot.lane.b32.xlu2 %v1451_v26, %s2903_s20  ;;  %v2373_v22 = vmul.f32 %v3559_v4, %v3936_v0 }
 0x381   :  { %v3658_v55 = vpop.permute.xlu2 %2138 }
 0x383   :  { %1797 = vrot.lane.b32.xlu1 %v1783_v11, %s2898_s15  ;;  %1679 = vrot.lane.b32.xlu0 %v1664_v14, %s2904_s21 }
 0x384   :  { %2258 = vrot.lane.b32.xlu2 %v3508_v49, %s2909_s26 }
 0x38b   :  { %1801 = vrot.lane.b32.xlu1 %v1785_v62, %s2898_s15  ;;  %1673 = vrot.lane.b32.xlu0 %v1661_v17, %s2904_s21  ;;  %v3937_v17 = vld [vmem:[#allocation28_spill] sm:$0xff] }
 0x38c   :  { %1675 = vrot.lane.b32.xlu2 %v1662_v18, %s2904_s21  ;;  %v1448_v18 = vmul.f32 %v3544_v51, %v3937_v17  ;;  %v3939_v51 = vld [vmem:[#allocation27_spill] sm:$0xff] }
 0x38d   :  { %v1447_v8 = vmul.f32 %v3539_v63, %v3939_v51 }
 0x393   :  { %2029 = vrot.lane.b32.xlu1 %v2015_v41, %s2905_s22  ;;  %1799 = vrot.lane.b32.xlu0 %v1784_v45, %s2898_s15 }
 0x394   :  { %1795 = vrot.lane.b32.xlu2 %v1782_v53, %s2898_s15 }
 0x39b   :  { %2033 = vrot.lane.b32.xlu1 %v2017_v27, %s2905_s22  ;;  %1793 = vrot.lane.b32.xlu0 %v1781_v30, %s2898_s15 }
 0x39c   :  { %2378 = vrot.lane.b32.xlu2 %v3508_v49, %s2906_s23 }
 0x3a3   :  { %2149 = vrot.lane.b32.xlu1 %v2135_v61, %s2906_s23  ;;  %2031 = vrot.lane.b32.xlu0 %v2016_v47, %s2905_s22  ;;  %v1446_v61 = vmul.f32 %v3556_v39, %v3938_v59 }
 0x3a4   :  { %2027 = vrot.lane.b32.xlu2 %v2014_v9, %s2905_s22  ;;  %v3940_v9 = vld [vmem:[#allocation29_spill] sm:$0xff] }
 0x3a5   :  { %v1445_v48 = vmul.f32 %v3559_v4, %v3940_v9 }
 0x3ab   :  { %2153 = vrot.lane.b32.xlu1 %v2137_v33, %s2906_s23  ;;  %2025 = vrot.lane.b32.xlu0 %v2013_v10, %s2905_s22 }
 0x3ac   :  { %2147 = vrot.lane.b32.xlu2 %v2134_v35, %s2906_s23 }
 0x3b3   :  { %2269 = vrot.lane.b32.xlu1 %v2255_v13, %s2908_s25  ;;  %2151 = vrot.lane.b32.xlu0 %v2136_v38, %s2906_s23 }
 0x3b4   :  { %2267 = vrot.lane.b32.xlu2 %v2254_v60, %s2908_s25 }
 0x3bb   :  { %2273 = vrot.lane.b32.xlu1 %v2257_v43, %s2908_s25  ;;  %2145 = vrot.lane.b32.xlu0 %v2133_v1, %s2906_s23 }
 0x3bc   :  { %2387 = vrot.lane.b32.xlu2 %v2374_v25, %s2910_s27 }
 0x3c3   :  { %2389 = vrot.lane.b32.xlu1 %v2375_v7, %s2910_s27  ;;  %2271 = vrot.lane.b32.xlu0 %v2256_v57, %s2908_s25 }
 0x3c6   :  { %v3666_v31 = vpop.permute.xlu2 %1907 }
 0x3cb   :  { %2393 = vrot.lane.b32.xlu1 %v2377_v28, %s2910_s27  ;;  %2265 = vrot.lane.b32.xlu0 %v2253_v50, %s2908_s25 }
 0x3cd   :  { %v3674_v5 = vpop.permute.xlu1 %1909 }
 0x3ce   :  { %v1472_v21 = vpop.permute.xlu2 %1471 }
 0x3d3   :  { %2391 = vrot.lane.b32.xlu0 %v2376_v24, %s2910_s27 }
 0x3d5   :  { %v3679_v20 = vpop.permute.xlu1 %1913  ;;  %v3681_v6 = vpop.permute.xlu0 %1911 }
 0x3d6   :  { %v1466_v23 = vpop.permute.xlu2 %1465  ;;  %v1918_v1 = vsel %vm690_vm13, %v3681_v6, %v3679_v20 }
 0x3db   :  { %2385 = vrot.lane.b32.xlu0 %v2373_v22, %s2910_s27 }
 0x3dd   :  { %v1470_v26 = vpop.permute.xlu1 %1469  ;;  %v3686_v11 = vpop.permute.xlu0 %1905 }
 0x3de   :  { %v1476_v14 = vsel %vm201_vm8, %v1470_v26, %v1472_v21  ;;  %v3689_v62 = vpop.permute.xlu2 %2258  ;;  %v1915_v7 = vsel %vm690_vm13, %v3686_v11, %v3666_v31 }
 0x3df   :  { %2697 = vmatpush.msk.msrb.mxu3 %vm209_vm9, %v1476_v14 }
 0x3e0   :  { %2698 = vmatmul.msk.f32.vlgmr.msrb.gmra.mxu3 %vm206_vm10, %v3519_v2 }
 0x3e1   :  { %2705 = vmatpush.msk.msra.mxu3 %vm209_vm9, %v1448_v18 }
 0x3e5   :  { %v1678_v41 = vpop.permute.xlu1 %1677  ;;  %v1468_v45 = vpop.permute.xlu0 %1467 }
 0x3e6   :  { %v1474_v53 = vsel %vm201_vm8, %v1466_v23, %v1468_v45  ;;  %v1475_v27 = vsel %vm201_vm8, %v1468_v45, %v1470_v26  ;;  %v1676_v30 = vpop.permute.xlu2 %1675 }
 0x3e7   :  { %2693 = vmatpush.msk.msrb.mxu1 %vm209_vm9, %v1474_v53  ;;  %2695 = vmatpush.msk.msrb.mxu2 %vm209_vm9, %v1475_v27  ;;  %v1684_v47 = vsel %vm435_vm11, %v1676_v30, %v1678_v41 }
 0x3e8   :  { %2694 = vmatmul.msk.f32.vlgmr.msrb.gmra.mxu1 %vm206_vm10, %v3519_v2  ;;  %2696 = vmatmul.msk.f32.vlgmr.msrb.gmra.mxu2 %vm206_vm10, %v3519_v2 }
 0x3e9   :  { %2701 = vmatpush.msk.msra.mxu1 %vm209_vm9, %v1446_v61  ;;  %2703 = vmatpush.msk.msra.mxu2 %vm209_vm9, %v1447_v8 }
 0x3ea   :  { %2706 = vmatmul.msk.f32.vlgmr.msra.gmra.mxu3 %vm206_vm10, %v3508_v49 }
 0x3eb   :  { %2709 = vmatpush.msk.msrb.mxu1 %vm209_vm9, %v1684_v47 }
 0x3ed   :  { %v1682_v39 = vpop.permute.xlu1 %1681  ;;  %v1464_v44 = vpop.permute.xlu0 %1463 }
 0x3ee   :  { %v1473_v63 = vsel %vm201_vm8, %v1464_v44, %v1466_v23  ;;  %v1796_v33 = vpop.permute.xlu2 %1795 }
 0x3ef   :  { %2691 = vmatpush.msk.msrb.mxu0 %vm209_vm9, %v1473_v63 }
 0x3f0   :  { %2692 = vmatmul.msk.f32.vlgmr.msrb.gmra.mxu0 %vm206_vm10, %v3519_v2  ;;  %2702 = vmatmul.msk.f32.vlgmr.msra.gmra.mxu1 %vm206_vm10, %v3508_v49  ;;  %v1916_v2 = vsel %vm690_vm13, %v3666_v31, %v3674_v5 }
 0x3f1   :  { %2699 = vmatpush.msk.msra.mxu0 %vm209_vm9, %v1445_v48  ;;  %2704 = vmatmul.msk.f32.vlgmr.msra.gmra.mxu2 %vm206_vm10, %v3508_v49 }
 0x3f5   :  { %v1798_v29 = vpop.permute.xlu1 %1797  ;;  %v1680_v10 = vpop.permute.xlu0 %1679 }
 0x3f6   :  { %v1804_v40 = vsel %vm577_vm12, %v1796_v33, %v1798_v29  ;;  %v1685_v35 = vsel %vm435_vm11, %v1678_v41, %v1680_v10  ;;  %v1686_v4 = vsel %vm435_vm11, %v1680_v10, %v1682_v39  ;;  %v3741_v19 = vpop.permute.xlu2 %2378 }
 0x3f7   :  { %2711 = vmatpush.msk.msrb.mxu2 %vm209_vm9, %v1685_v35  ;;  %2713 = vmatpush.msk.msrb.mxu3 %vm209_vm9, %v1686_v4 }
 0x3f8   :  { %2717 = vmatpush.msk.msra.mxu1 %vm209_vm9, %v1804_v40  ;;  %2700 = vmatmul.msk.f32.vlgmr.msra.gmra.mxu0 %vm206_vm10, %v3508_v49 }
 0x3f9   :  { %2710 = vmatmul.msk.f32.vlgmr.msrb.gmra.mxu1 %vm206_vm10, %v3534_v56  ;;  %2712 = vmatmul.msk.f32.vlgmr.msrb.gmra.mxu2 %vm206_vm10, %v3534_v56 }
 0x3fa   :  { %2714 = vmatmul.msk.f32.vlgmr.msrb.gmra.mxu3 %vm206_vm10, %v3534_v56  ;;  %2725 = vmatpush.msk.msrb.mxu1 %vm209_vm9, %v1916_v2 }
 0x3fd   :  { %v1802_v13 = vpop.permute.xlu1 %1801  ;;  %v1674_v37 = vpop.permute.xlu0 %1673 }
 0x3fe   :  { %v1683_v49 = vsel %vm435_vm11, %v1674_v37, %v1676_v30  ;;  %v2028_v38 = vpop.permute.xlu2 %2027 }
 0x3ff   :  { %2707 = vmatpush.msk.msrb.mxu0 %vm209_vm9, %v1683_v49 }
 0x400   :  { %2708 = vmatmul.msk.f32.vlgmr.msrb.gmra.mxu0 %vm206_vm10, %v3534_v56  ;;  %v1917_v56 = vsel %vm690_vm13, %v3674_v5, %v3681_v6 }
 0x401   :  { %2718 = vmatmul.msk.f32.vlgmr.msra.gmra.mxu1 %vm206_vm10, %v3536_v34 }
 0x405   :  { %v2030_v3 = vpop.permute.xlu1 %2029  ;;  %v1800_v60 = vpop.permute.xlu0 %1799 }
 0x406   :  { %v2036_v12 = vsel %vm832_vm14, %v2028_v38, %v2030_v3  ;;  %v1805_v43 = vsel %vm577_vm12, %v1798_v29, %v1800_v60  ;;  %v1806_v46 = vsel %vm577_vm12, %v1800_v60, %v1802_v13  ;;  %v2148_v54 = vpop.permute.xlu2 %2147 }
 0x407   :  { %2719 = vmatpush.msk.msra.mxu2 %vm209_vm9, %v1805_v43  ;;  %2721 = vmatpush.msk.msra.mxu3 %vm209_vm9, %v1806_v46 }
 0x408   :  { %2733 = vmatpush.msk.msra.mxu1 %vm209_vm9, %v2036_v12  ;;  %2720 = vmatmul.msk.f32.vlgmr.msra.gmra.mxu2 %vm206_vm10, %v3536_v34 }
 0x409   :  { %2722 = vmatmul.msk.f32.vlgmr.msra.gmra.mxu3 %vm206_vm10, %v3536_v34  ;;  %2726 = vmatmul.msk.f32.vlgmr.msrb.gmra.mxu1 %vm206_vm10, %v3627_v42 }
 0x40a   :  { %2727 = vmatpush.msk.msrb.mxu2 %vm209_vm9, %v1917_v56  ;;  %2729 = vmatpush.msk.msrb.mxu3 %vm209_vm9, %v1918_v1 }
 0x40d   :  { %v2034_v16 = vpop.permute.xlu1 %2033  ;;  %v1794_v25 = vpop.permute.xlu0 %1793 }
 0x40e   :  { %v1803_v15 = vsel %vm577_vm12, %v1794_v25, %v1796_v33  ;;  %v2268_v21 = vpop.permute.xlu2 %2267 }
 0x40f   :  { %2715 = vmatpush.msk.msra.mxu0 %vm209_vm9, %v1803_v15 }
 0x410   :  { %2716 = vmatmul.msk.f32.vlgmr.msra.gmra.mxu0 %vm206_vm10, %v3536_v34  ;;  %2728 = vmatmul.msk.f32.vlgmr.msrb.gmra.mxu2 %vm206_vm10, %v3627_v42 }
 0x411   :  { %2723 = vmatpush.msk.msrb.mxu0 %vm209_vm9, %v1915_v7  ;;  %2730 = vmatmul.msk.f32.vlgmr.msrb.gmra.mxu3 %vm206_vm10, %v3627_v42 }
 0x412   :  { %2734 = vmatmul.msk.f32.vlgmr.msra.gmra.mxu1 %vm206_vm10, %v3644_v52 }
 0x415   :  { %v2150_v57 = vpop.permute.xlu1 %2149  ;;  %v2032_v58 = vpop.permute.xlu0 %2031 }
 0x416   :  { %v2156_v28 = vsel %vm974_vm15, %v2148_v54, %v2150_v57  ;;  %v2037_v31 = vsel %vm832_vm14, %v2030_v3, %v2032_v58  ;;  %v2038_v34 = vsel %vm832_vm14, %v2032_v58, %v2034_v16  ;;  %v2388_v22 = vpop.permute.xlu2 %2387 }
 0x417   :  { %2735 = vmatpush.msk.msra.mxu2 %vm209_vm9, %v2037_v31  ;;  %2737 = vmatpush.msk.msra.mxu3 %vm209_vm9, %v2038_v34 }
 0x418   :  { %2741 = vmatpush.msk.msrb.mxu1 %vm209_vm9, %v2156_v28  ;;  %2724 = vmatmul.msk.f32.vlgmr.msrb.gmra.mxu0 %vm206_vm10, %v3627_v42 }
 0x419   :  { %2736 = vmatmul.msk.f32.vlgmr.msra.gmra.mxu2 %vm206_vm10, %v3644_v52  ;;  %2738 = vmatmul.msk.f32.vlgmr.msra.gmra.mxu3 %vm206_vm10, %v3644_v52 }
 0x41a   :  { %2742 = vmatmul.msk.f32.vlgmr.msrb.gmra.mxu1 %vm206_vm10, %v3658_v55 }
 0x41d   :  { %v2154_v32 = vpop.permute.xlu1 %2153  ;;  %v2026_v50 = vpop.permute.xlu0 %2025 }
 0x41e   :  { %v2035_v5 = vsel %vm832_vm14, %v2026_v50, %v2028_v38 }
 0x41f   :  { %2731 = vmatpush.msk.msra.mxu0 %vm209_vm9, %v2035_v5 }
 0x420   :  { %2732 = vmatmul.msk.f32.vlgmr.msra.gmra.mxu0 %vm206_vm10, %v3644_v52 }
 0x425   :  { %v2270_v42 = vpop.permute.xlu1 %2269  ;;  %v2152_v36 = vpop.permute.xlu0 %2151 }
 0x426   :  { %v2276_v24 = vsel %vm1116_vm1, %v2268_v21, %v2270_v42  ;;  %v2157_v20 = vsel %vm974_vm15, %v2150_v57, %v2152_v36  ;;  %v2158_v6 = vsel %vm974_vm15, %v2152_v36, %v2154_v32 }
 0x427   :  { %2743 = vmatpush.msk.msrb.mxu2 %vm209_vm9, %v2157_v20  ;;  %2745 = vmatpush.msk.msrb.mxu3 %vm209_vm9, %v2158_v6 }
 0x428   :  { %2749 = vmatpush.msk.msra.mxu1 %vm209_vm9, %v2276_v24  ;;  %2744 = vmatmul.msk.f32.vlgmr.msrb.gmra.mxu2 %vm206_vm10, %v3658_v55 }
 0x429   :  { %2746 = vmatmul.msk.f32.vlgmr.msrb.gmra.mxu3 %vm206_vm10, %v3658_v55  ;;  %2750 = vmatmul.msk.f32.vlgmr.msra.gmra.mxu1 %vm206_vm10, %v3689_v62 }
 0x42d   :  { %v2274_v52 = vpop.permute.xlu1 %2273  ;;  %v2146_v23 = vpop.permute.xlu0 %2145 }
 0x42e   :  { %v2155_v0 = vsel %vm974_vm15, %v2146_v23, %v2148_v54 }
 0x42f   :  { %2739 = vmatpush.msk.msrb.mxu0 %vm209_vm9, %v2155_v0 }
 0x430   :  { %2740 = vmatmul.msk.f32.vlgmr.msrb.gmra.mxu0 %vm206_vm10, %v3658_v55 }
 0x435   :  { %v2390_v26 = vpop.permute.xlu1 %2389  ;;  %v2272_v11 = vpop.permute.xlu0 %2271 }
 0x436   :  { %v2396_v14 = vsel %vm1258_vm2, %v2388_v22, %v2390_v26  ;;  %v2277_v17 = vsel %vm1116_vm1, %v2270_v42, %v2272_v11  ;;  %v2278_v18 = vsel %vm1116_vm1, %v2272_v11, %v2274_v52 }
 0x437   :  { %2751 = vmatpush.msk.msra.mxu2 %vm209_vm9, %v2277_v17  ;;  %2753 = vmatpush.msk.msra.mxu3 %vm209_vm9, %v2278_v18 }
 0x438   :  { %2757 = vmatpush.msk.msrb.mxu1 %vm209_vm9, %v2396_v14  ;;  %2752 = vmatmul.msk.f32.vlgmr.msra.gmra.mxu2 %vm206_vm10, %v3689_v62 }
 0x439   :  { %2754 = vmatmul.msk.f32.vlgmr.msra.gmra.mxu3 %vm206_vm10, %v3689_v62  ;;  %2758 = vmatmul.msk.f32.vlgmr.msrb.gmra.mxu1 %vm206_vm10, %v3741_v19 }
 0x43d   :  { %v2266_v55 = vpop.permute.xlu0 %2265  ;;  %v2394_v45 = vpop.permute.xlu1 %2393 }
 0x43e   :  { %v2275_v41 = vsel %vm1116_vm1, %v2266_v55, %v2268_v21 }
 0x43f   :  { %2747 = vmatpush.msk.msra.mxu0 %vm209_vm9, %v2275_v41 }
 0x440   :  { %2748 = vmatmul.msk.f32.vlgmr.msra.gmra.mxu0 %vm206_vm10, %v3689_v62 }
 0x445   :  { %v2392_v53 = vpop.permute.xlu0 %2391 }
 0x446   :  { %v2397_v27 = vsel %vm1258_vm2, %v2390_v26, %v2392_v53  ;;  %v2398_v30 = vsel %vm1258_vm2, %v2392_v53, %v2394_v45 }
 0x447   :  { %2759 = vmatpush.msk.msrb.mxu2 %vm209_vm9, %v2397_v27  ;;  %2761 = vmatpush.msk.msrb.mxu3 %vm209_vm9, %v2398_v30 }
 0x448   :  { %2760 = vmatmul.msk.f32.vlgmr.msrb.gmra.mxu2 %vm206_vm10, %v3741_v19  ;;  %2762 = vmatmul.msk.f32.vlgmr.msrb.gmra.mxu3 %vm206_vm10, %v3741_v19 }
 0x44d   :  { %v2386_v59 = vpop.permute.xlu0 %2385 }
 0x44e   :  { %v2395_v61 = vsel %vm1258_vm2, %v2386_v59, %v2388_v22 }
 0x44f   :  { %2755 = vmatpush.msk.msrb.mxu0 %vm209_vm9, %v2395_v61 }
 0x450   :  { %2756 = vmatmul.msk.f32.vlgmr.msrb.gmra.mxu0 %vm206_vm10, %v3741_v19 }
 0x463   :  { %v1564_v8 = vpop.f32.mrf.mxu3 }
 0x465   :  { %v1524_v62 = vpop.f32.mrf.mxu1 }
 0x46b   :  { %v1544_v51 = vpop.f32.mrf.mxu2 }
 0x46d   :  { %v1504_v47 = vpop.f32.mrf.mxu0  ;;  %v1618_v39 = vpop.f32.mrf.mxu1 }
 0x46e   :  { %v1658_v63 = vpop.f32.mrf.mxu3  ;;  %v1619_v1 = vadd.f32 %v1618_v39, %v1524_v62 }
 0x46f   :  { %v1659_v54 = vadd.f32 %v1658_v63, %v1564_v8 }
 0x474   :  { %v1638_v44 = vpop.f32.mrf.mxu2 }
 0x475   :  { %v1598_v9 = vpop.f32.mrf.mxu0  ;;  %v1639_v25 = vadd.f32 %v1638_v44, %v1544_v51 }
 0x476   :  { %v1734_v48 = vpop.f32.mrf.mxu1  ;;  %v1599_v57 = vadd.f32 %v1598_v9, %v1504_v47 }
 0x477   :  { %v1778_v15 = vadd.f32 %v1734_v48, %v1619_v1 }
 0x47c   :  { %v1754_v33 = vpop.f32.mrf.mxu2 }
 0x47d   :  { %v1774_v29 = vpop.f32.mrf.mxu3  ;;  %v1714_v10 = vpop.f32.mrf.mxu0  ;;  %v1779_v58 = vadd.f32 %v1754_v33, %v1639_v25 }
 0x47e   :  { %v1854_v40 = vpop.f32.mrf.mxu1  ;;  %v1780_v31 = vadd.f32 %v1774_v29, %v1659_v54  ;;  %v1777_v34 = vadd.f32 %v1714_v10, %v1599_v57 }
 0x47f   :  { %v1898_v28 = vadd.f32 %v1854_v40, %v1778_v15 }
 0x486   :  { %v1966_v13 = vpop.f32.mrf.mxu1 }
 0x487   :  { %v2010_v32 = vadd.f32 %v1966_v13, %v1898_v28 }
 0x48b   :  { %v1874_v35 = vpop.f32.mrf.mxu2 }
 0x48c   :  { %v1894_v4 = vpop.f32.mrf.mxu3  ;;  %v1899_v50 = vadd.f32 %v1874_v35, %v1779_v58  ;;  %v2519_v58 = vld [vmem:[%s3872_s5] sm:$0xf]  ;;  %s2912_s5 = smov [#allocation5]  }
 0x48d   :  { %v1834_v2 = vpop.f32.mrf.mxu0  ;;  %v1900_v42 = vadd.f32 %v1894_v4, %v1780_v31 }
 0x48e   :  { %v1897_v36 = vadd.f32 %v1834_v2, %v1777_v34 }
 0x48f   :  { %v2086_v38 = vpop.f32.mrf.mxu1 }
 0x490   :  { %v2130_v24 = vadd.f32 %v2086_v38, %v2010_v32  ;;  %v2545_v32 = vld [vmem:[%s3873_s6] sm:$0xf]  ;;  %s2591_s6 = sshll.u32 %s2912_s5, 4  ;;  %s2592_s6 = int_to_ptr.vmem [resolvable:$true] %s2591_s6 }
 0x493   :  { %v1986_v37 = vpop.f32.mrf.mxu2 }
 0x494   :  { %v2006_v49 = vpop.f32.mrf.mxu3  ;;  %v2011_v20 = vadd.f32 %v1986_v37, %v1899_v50 }
 0x495   :  { %v1946_v19 = vpop.f32.mrf.mxu0  ;;  %v2012_v52 = vadd.f32 %v2006_v49, %v1900_v42 }
 0x496   :  { %v2009_v23 = vadd.f32 %v1946_v19, %v1897_v36 }
 0x497   :  { %v2206_v43 = vpop.f32.mrf.mxu1 }
 0x498   :  { %v2250_v0 = vadd.f32 %v2206_v43, %v2130_v24 }
 0x49c   :  { %v2106_v3 = vpop.f32.mrf.mxu2  ;;  %v2126_v60 = vpop.f32.mrf.mxu3 }
 0x49d   :  { %v2066_v12 = vpop.f32.mrf.mxu0  ;;  %v2131_v22 = vadd.f32 %v2106_v3, %v2011_v20  ;;  %v2132_v11 = vadd.f32 %v2126_v60, %v2012_v52 }
 0x49e   :  { %v2129_v14 = vadd.f32 %v2066_v12, %v2009_v23  ;;  %v2560_v23 = vld.sshfl [vmem:[#allocation1 + $0x10] sm:$0xff pattern:$0x75316420] }
 0x4a6   :  { %v2326_v7 = vpop.f32.mrf.mxu1 }
 0x4a7   :  { %v2370_v17 = vadd.f32 %v2326_v7, %v2250_v0  ;;  %v2561_v0 = vld.sshfl [vmem:[#allocation1 + $0x18] sm:$0xff pattern:$0x75316420] }
 0x4ab   :  { %v2226_v46 = vpop.f32.mrf.mxu2 }
 0x4ac   :  { %v2246_v56 = vpop.f32.mrf.mxu3  ;;  %v2251_v18 = vadd.f32 %v2226_v46, %v2131_v22 }
 0x4ad   :  { %v2186_v16 = vpop.f32.mrf.mxu0  ;;  %v2252_v55 = vadd.f32 %v2246_v56, %v2132_v11  ;;  %v2559_v11 = vld.sshfl [vmem:[#allocation1 + $0x8] sm:$0xff pattern:$0x75316420] }
 0x4ae   :  { %v2249_v41 = vadd.f32 %v2186_v16, %v2129_v14 }
 0x4b6   :  { %v2446_v26 = vpop.f32.mrf.mxu1 }
 0x4b7   :  { %v2490_v45 = vadd.f32 %v2446_v26, %v2370_v17  ;;  %v2558_v26 = vld.sshfl [vmem:[#allocation1] sm:$0xff pattern:$0x75316420] }
 0x4b9   :  { %v2504_v8 = vmul.f32 %v2490_v45, %v2490_v45  ;;  %v2494_v44 = vsel %vm209_vm9, %v2490_v45, 0.0 }
 0x4bb   :  { %v2346_v5 = vpop.f32.mrf.mxu2  ;;  %v2508_v35 = vsel %vm209_vm9, %v2504_v8, 0.0 }
 0x4bc   :  { %v2366_v21 = vpop.f32.mrf.mxu3  ;;  %v2371_v53 = vadd.f32 %v2346_v5, %v2251_v18 }
 0x4bd   :  { %v2306_v6 = vpop.f32.mrf.mxu0  ;;  %v2372_v59 = vadd.f32 %v2366_v21, %v2252_v55 }
 0x4be   :  { %v2369_v61 = vadd.f32 %v2306_v6, %v2249_v41 }
 0x4cb   :  { %v2466_v27 = vpop.f32.mrf.mxu2  ;;  %v2486_v30 = vpop.f32.mrf.mxu3 }
 0x4cc   :  { %v2491_v62 = vadd.f32 %v2466_v27, %v2371_v53  ;;  %v2492_v47 = vadd.f32 %v2486_v30, %v2372_v59 }
 0x4cd   :  { %v2426_v51 = vpop.f32.mrf.mxu0 }
 0x4ce   :  { %v2489_v39 = vadd.f32 %v2426_v51, %v2369_v61  ;;  %v2505_v63 = vmul.f32 %v2491_v62, %v2491_v62  ;;  %v2496_v29 = vsel %vm209_vm9, %v2491_v62, 0.0  ;;  %v2506_v10 = vmul.f32 %v2492_v47, %v2492_v47 }
 0x4cf   :  { %v2498_v13 = vsel %vm209_vm9, %v2492_v47, 0.0 }
 0x4d0   :  { %v2493_v9 = vsel %vm209_vm9, %v2489_v39, 0.0  ;;  %v2503_v48 = vmul.f32 %v2489_v39, %v2489_v39  ;;  %v2510_v37 = vsel %vm209_vm9, %v2505_v63, 0.0  ;;  %v2512_v38 = vsel %vm209_vm9, %v2506_v10, 0.0 }
 0x4d1   :  { %v2495_v33 = vadd.f32 %v2494_v44, %v2493_v9 }
 0x4d2   :  { %v2507_v40 = vsel %vm209_vm9, %v2503_v48, 0.0 }
 0x4d3   :  { %v2497_v4 = vadd.f32 %v2496_v29, %v2495_v33  ;;  %v2509_v2 = vadd.f32 %v2508_v35, %v2507_v40 }
 0x4d5   :  { %v2499_v49 = vadd.f32 %v2498_v13, %v2497_v4  ;;  %v2511_v19 = vadd.f32 %v2510_v37, %v2509_v2 }
 0x4d7   :  { %2500 = vadd.xlane.f32.xlu1 %v2499_v49  ;;  %v2513_v3 = vadd.f32 %v2512_v38, %v2511_v19 }
 0x4d9   :  { %2514 = vadd.xlane.f32.xlu0 %v2513_v3 }
 0x54a   :  { %v2501_v60 = vpop.xlane.xlu1 %2500 }
 0x54b   :  { %v2502_v12 = vmul.f32 0.001953125, %v2501_v60 }
 0x54c   :  { %v2515_v43 = vpop.xlane.xlu0 %2514 }
 0x54d   :  { %v2516_v46 = vmul.f32 0.001953125, %v2515_v43  ;;  %v2517_v56 = vmul.f32 %v2502_v12, %v2502_v12  ;;  %v2532_v5 = vsub.f32 %v2489_v39, %v2502_v12  ;;  %v2533_v21 = vsub.f32 %v2490_v45, %v2502_v12 }
 0x54e   :  { %v2534_v42 = vsub.f32 %v2491_v62, %v2502_v12  ;;  %v2535_v36 = vsub.f32 %v2492_v47, %v2502_v12 }
 0x54f   :  { %v2518_v1 = vsub.f32 %v2516_v46, %v2517_v56 }
 0x551   :  { %v2520_v16 = vadd.f32 1e-05, %v2518_v1 }
 0x553   :  { %2833 = vrsqrt.f32 %v2520_v16  ;;  %vm2527_vm6 = vweird.f32 %v2520_v16 }
 0x559   :  { %v2834_v25 = vpop.eup %2833 }
 0x55a   :  { %v2522_v15 = vmul.f32 %v2834_v25, %v2520_v16  ;;  %vm2528_vm0 = vweird.f32 %v2834_v25 }
 0x55b   :  { %vm2529_vm7 = vmor %vm2527_vm6, %vm2528_vm0 }
 0x55c   :  { %v2523_v7 = vmul.f32 %v2834_v25, %v2522_v15 }
 0x55e   :  { %v2524_v54 = vmul.f32 0.5, %v2523_v7 }
 0x560   :  { %v2525_v57 = vsub.f32 1.5, %v2524_v54 }
 0x562   :  { %v2526_v28 = vmul.f32 %v2834_v25, %v2525_v57 }
 0x564   :  { %v2530_v31 = vsel %vm2529_vm7, %v2834_v25, %v2526_v28 }
 0x565   :  { %v2531_v34 = vmul.f32 %v2530_v31, %v2519_v58 }
 0x567   :  { %2538 = vperm.xlu2 %2829, %v2531_v34  }
 0x56f   :  { %2548 = vperm.xlu2 %2829, %v2545_v32  }
 0x5c1   :  { %v2539_v50 = vpop.permute.xlu2 %2538 }
 0x5c2   :  { %v2541_v24 = vmul.f32 %v2539_v50, %v2532_v5  ;;  %v2542_v20 = vmul.f32 %v2539_v50, %v2533_v21  ;;  %v2543_v6 = vmul.f32 %v2539_v50, %v2534_v42  ;;  %v2544_v52 = vmul.f32 %v2539_v50, %v2535_v36 }
 0x5c9   :  { %v2549_v22 = vpop.permute.xlu2 %2548 }
 0x5ca   :  { %v2551_v14 = vadd.f32 %v2549_v22, %v2541_v24  ;;  %v2552_v17 = vadd.f32 %v2549_v22, %v2542_v20  ;;  %v2553_v18 = vadd.f32 %v2549_v22, %v2543_v6  ;;  %v2554_v55 = vadd.f32 %v2549_v22, %v2544_v52 }
 0x5cc   :  { %v2566_v41 = vadd.f32 %v2558_v26, %v2551_v14  ;;  %v2567_v53 = vadd.f32 %v2559_v11, %v2552_v17  ;;  %v2568_v27 = vadd.f32 %v2560_v23, %v2553_v18  ;;  %v2569_v30 = vadd.f32 %v2561_v0, %v2554_v55 }
 0x5ce   :  { %v2571_v45 = vmax.f32 %v2567_v53, 0.0  ;;  %v2573_v59 = vmax.f32 %v2569_v30, 0.0  ;;  %v2570_v61 = vmax.f32 %v2566_v41, 0.0  ;;  %v2572_v62 = vmax.f32 %v2568_v27, 0.0 }
 0x5d0   :  { %v2578_v51 = vrot.slane %v2571_v45, 4  ;;  %v2579_v8 = vrot.slane %v2573_v59, 4 }
 0x5d2   :  { %v2580_v47 = vsel %vm209_vm9, %v2570_v61, %v2578_v51  ;;  %v2581_v39 = vsel %vm209_vm9, %v2572_v62, %v2579_v8 }
 0x5d3   :  { %2584 = vst [vmem:[#allocation5] sm:$0xff] %v2580_v47 }
 0x5d4   :  { %2585 = vst [vmem:[#allocation5 + $0x8] sm:$0xff] %v2581_v39 }
 0x5d5   :  { %2596 = dma.vmem_to_hbm [thread:$0]  %s2592_s6, 256, %s2594_s13, [#allocation4]  }
 0x5d6   :  { %2885 = dma.done.wait [#allocation4], 256  }
 0x5d7   :  { %2886 = vsyncadd [#allocation4], 4294967040 }
 0x5d8   :  { %2601 = vsyncpa [#allocation3], 1 }
 0x5d9   :  { %2602 = vsyncpa [#allocation4], 1 }

</bundles_post_ra>
